<compile_context>
chip_gen: v7x
topology: tpu7x:2x2x1
jax: 0.10.0
libtpu: 0.0.40
codegen_flags: <defaults>
</compile_context>

<pallas_src>
import functools

import jax
import jax.numpy as jnp
from jax import lax
from jax.experimental import pallas as pl
from jax.experimental.pallas import tpu as pltpu


# ----------------------------- fused basic-block kernel ------------------------------

def _basic_block_kernel(*refs, stride, equal, bb):
    if equal:
        (x_ref, bn1s_ref, bn1b_ref, w1_ref, bn2b_ref, w2_ref,
         o_ref, ypad_ref, hpad_ref) = refs
        short_w_ref = None
    else:
        (x_ref, bn1s_ref, bn1b_ref, w1_ref, bn2b_ref, w2_ref, short_w_ref,
         o_ref, ypad_ref, hpad_ref) = refs

    _, H, W, Cin = x_ref.shape
    _, _, Cout = o_ref.shape
    s = stride
    Ho = (H - 1) // s + 1
    Wo = (W - 1) // s + 1
    f32 = jnp.float32

    # ---- zero ONLY the 1-wide halo border (interior is fully overwritten) ----
    ypad_ref[0:1, :, :] = jnp.zeros((1, W + 2, Cin), f32)
    ypad_ref[H + 1:H + 2, :, :] = jnp.zeros((1, W + 2, Cin), f32)
    ypad_ref[1:H + 1, 0:1, :] = jnp.zeros((H, 1, Cin), f32)
    ypad_ref[1:H + 1, W + 1:W + 2, :] = jnp.zeros((H, 1, Cin), f32)

    hpad_ref[0:1, :, :] = jnp.zeros((1, Wo + 2, Cout), f32)
    hpad_ref[Ho + 1:Ho + 2, :, :] = jnp.zeros((1, Wo + 2, Cout), f32)
    hpad_ref[1:Ho + 1, 0:1, :] = jnp.zeros((Ho, 1, Cout), f32)
    hpad_ref[1:Ho + 1, Wo + 1:Wo + 2, :] = jnp.zeros((Ho, 1, Cout), f32)

    def tap(ref, kh, kw):
        # Strided taps: read only the Ho*Wo rows that the strided conv needs.
        if s == 1:
            return ref[kh:kh + Ho, kw:kw + Wo, :]
        return ref[pl.ds(kh, Ho, stride=s), pl.ds(kw, Wo, stride=s), :]

    for b in range(bb):                                   # static batch-block loop
        # ---- bn1 + relu prologue (VPU), written into the padded scratch ----
        y = jnp.maximum(x_ref[b].astype(f32) * bn1s_ref[...] + bn1b_ref[...], 0.0)
        ypad_ref[1:H + 1, 1:W + 1, :] = y                 # y not kept live further

        # ---- conv1 (stride s) as 9 shifted/strided-window matmuls on the MXU ----
        # bn2's per-channel scale is pre-folded into w1 host-side.
        acc = None
        for kh in range(3):
            for kw in range(3):
                win = tap(ypad_ref, kh, kw).reshape(Ho * Wo, Cin)
                d = jnp.dot(win, w1_ref[kh, kw], preferred_element_type=f32)
                acc = d if acc is None else acc + d

        # ---- bn2 shift + relu (drop_rate == 0 -> dropout is identity) ----
        h = jnp.maximum(acc + bn2b_ref[...], 0.0)         # (Ho*Wo, Cout)
        hpad_ref[1:Ho + 1, 1:Wo + 1, :] = h.reshape(Ho, Wo, Cout)

        # ---- conv2 (stride 1): 9 shifted-window matmuls ----
        acc2 = None
        for kh in range(3):
            for kw in range(3):
                win = hpad_ref[kh:kh + Ho, kw:kw + Wo, :].reshape(Ho * Wo, Cout)
                d = jnp.dot(win, w2_ref[kh, kw], preferred_element_type=f32)
                acc2 = d if acc2 is None else acc2 + d

        # ---- shortcut, re-read at the epilogue (short live ranges) ----
        if equal:                                          # identity shortcut (s == 1)
            short = x_ref[b].astype(f32).reshape(H * W, Cin)
        else:                                              # 1x1 conv on strided relu(bn1(x))
            ys = tap(ypad_ref, 1, 1).reshape(Ho * Wo, Cin)
            short = jnp.dot(ys, short_w_ref[...], preferred_element_type=f32)

        o_ref[b] = (acc2 + short).astype(o_ref.dtype)      # flat (Ho*Wo, Cout) store


# ----------------------------- kernel wrapper ------------------------------

def _pick_block_batch(n):
    # Amortize per-grid-step overhead (~0.35 us), but keep >= 2 grid steps so
    # the "parallel" batch axis can still shard across TensorCores (megacore).
    for bb in (8, 4, 2):
        if n % bb == 0 and n // bb >= 2:
            return bb
    return 1


def basic_block_forward(x, p, *, block_batch=None):
    """One fused pre-activation BasicBlock. x: (N, H, W, Cin) NHWC."""
    N, H, W, Cin = x.shape
    Cout = p['conv1_w'].shape[-1]
    s = p['stride']
    equal = p['equal']
    Ho = (H - 1) // s + 1
    Wo = (W - 1) // s + 1
    bb = block_batch if block_batch is not None else _pick_block_batch(N)
    assert N % bb == 0

    # Fold bn2's per-output-channel scale into conv1 weights (free; removes a
    # full-slab VPU multiply inside the kernel). bn2's shift stays as a bias.
    w1 = p['conv1_w'] * p['bn2_scale'].reshape(1, 1, 1, Cout)

    in_specs = [
        pl.BlockSpec((bb, H, W, Cin), lambda n: (n, 0, 0, 0)),
        pl.BlockSpec((1, Cin), lambda n: (0, 0)),
        pl.BlockSpec((1, Cin), lambda n: (0, 0)),
        pl.BlockSpec((3, 3, Cin, Cout), lambda n: (0, 0, 0, 0)),
        pl.BlockSpec((1, Cout), lambda n: (0, 0)),
        pl.BlockSpec((3, 3, Cout, Cout), lambda n: (0, 0, 0, 0)),
    ]
    args = [x, p['bn1_scale'], p['bn1_shift'], w1, p['bn2_shift'], p['conv2_w']]
    if not equal:
        in_specs.append(pl.BlockSpec((Cin, Cout), lambda n: (0, 0)))
        args.append(p['short_w'])

    kernel = functools.partial(_basic_block_kernel, stride=s, equal=equal, bb=bb)
    out_flat = pl.pallas_call(
        kernel,
        out_shape=jax.ShapeDtypeStruct((N, Ho * Wo, Cout), x.dtype),
        grid=(N // bb,),
        in_specs=in_specs,
        out_specs=pl.BlockSpec((bb, Ho * Wo, Cout), lambda n: (n, 0, 0)),
        scratch_shapes=[pltpu.VMEM((H + 2, W + 2, Cin), jnp.float32),
                        pltpu.VMEM((Ho + 2, Wo + 2, Cout), jnp.float32)],
        compiler_params=pltpu.CompilerParams(
            dimension_semantics=("parallel",),
            vmem_limit_bytes=32 * 1024 * 1024),
    )(*args)
    return out_flat.reshape(N, Ho, Wo, Cout)


# ----------------------------- parameter init ------------------------------

_BN_EPS = 1e-5


def _init_bn(key, c):
    kg, kb, km, kv = jax.random.split(key, 4)
    gamma = 1.0 + 0.1 * jax.random.normal(kg, (c,), jnp.float32)
    beta = 0.1 * jax.random.normal(kb, (c,), jnp.float32)
    r_mean = 0.1 * jax.random.normal(km, (c,), jnp.float32)
    r_var = 1.0 + 0.1 * jnp.abs(jax.random.normal(kv, (c,), jnp.float32))
    scale = gamma / jnp.sqrt(r_var + _BN_EPS)
    shift = beta - r_mean * scale
    return scale.reshape(1, c), shift.reshape(1, c)


def init_basic_block_params(key, in_planes, out_planes, stride):
    equal = (in_planes == out_planes)
    # Canonical WRN never pairs an identity shortcut with stride > 1 (PyTorch
    # would shape-mismatch at the residual add too).
    assert not (equal and stride > 1), "identity shortcut with stride>1 unsupported"
    k = jax.random.split(key, 5)
    bn1_scale, bn1_shift = _init_bn(k[0], in_planes)
    conv1_w = (jax.random.normal(k[1], (3, 3, in_planes, out_planes), jnp.float32)
               * (2.0 / (9 * in_planes)) ** 0.5)
    bn2_scale, bn2_shift = _init_bn(k[2], out_planes)
    conv2_w = (jax.random.normal(k[3], (3, 3, out_planes, out_planes), jnp.float32)
               * (2.0 / (9 * out_planes)) ** 0.5)
    short_w = None
    if not equal:
        short_w = (jax.random.normal(k[4], (in_planes, out_planes), jnp.float32)
                   * (2.0 / in_planes) ** 0.5)
    return dict(bn1_scale=bn1_scale, bn1_shift=bn1_shift, conv1_w=conv1_w,
                bn2_scale=bn2_scale, bn2_shift=bn2_shift, conv2_w=conv2_w,
                short_w=short_w, stride=stride, equal=equal)


def init_network_block_params(key, nb_layers, in_planes, out_planes, stride):
    keys = jax.random.split(key, nb_layers)
    params = []
    for i in range(int(nb_layers)):
        cin = in_planes if i == 0 else out_planes
        s = stride if i == 0 else 1
        params.append(init_basic_block_params(keys[i], cin, out_planes, s))
    return params


# ----------------------------- forward pass ------------------------------

def network_block_forward(x_nchw, params):
    # PyTorch input is NCHW; kernels run in NHWC (channels on TPU lanes).
    x = jnp.transpose(x_nchw, (0, 2, 3, 1))
    for p in params:
        x = basic_block_forward(x, p)
    return jnp.transpose(x, (0, 3, 1, 2))


# ----------------------------- pure-JAX reference ------------------------------

def _ref_basic_block(x, p):
    s = p['stride']
    hp = lax.Precision.HIGHEST
    y = jnp.maximum(x * p['bn1_scale'] + p['bn1_shift'], 0.0)
    h = lax.conv_general_dilated(y, p['conv1_w'], (s, s), ((1, 1), (1, 1)),
                                 dimension_numbers=('NHWC', 'HWIO', 'NHWC'),
                                 precision=hp)
    h = jnp.maximum(h * p['bn2_scale'] + p['bn2_shift'], 0.0)
    h = lax.conv_general_dilated(h, p['conv2_w'], (1, 1), ((1, 1), (1, 1)),
                                 dimension_numbers=('NHWC', 'HWIO', 'NHWC'),
                                 precision=hp)
    if p['equal']:
        short = x
    else:
        w = p['short_w'].reshape(1, 1, *p['short_w'].shape)
        short = lax.conv_general_dilated(y, w, (s, s), ((0, 0), (0, 0)),
                                         dimension_numbers=('NHWC', 'HWIO', 'NHWC'),
                                         precision=hp)
    return short + h


# ----------------------------- main ------------------------------

if __name__ == "__main__":
    nb_layers, in_planes, out_planes, stride = 2, 4, 8, 2
    key = jax.random.PRNGKey(0)
    kx, kp = jax.random.split(key)

    x_nchw = jax.random.normal(kx, (2, in_planes, 16, 16), jnp.float32)
    params = init_network_block_params(kp, nb_layers, in_planes, out_planes, stride)

    out = network_block_forward(x_nchw, params)
    out = jax.block_until_ready(out)

    # sanity check against a pure-JAX reference
    ref = jnp.transpose(x_nchw, (0, 2, 3, 1))
    for p in params:
        ref = _ref_basic_block(ref, p)
    ref = jnp.transpose(ref, (0, 3, 1, 2))
    assert out.shape == ref.shape, (out.shape, ref.shape)
    max_err = float(jnp.max(jnp.abs(out - ref)))
    assert jnp.allclose(out, ref, atol=1e-3, rtol=1e-3), max_err

    print("KERNEL_OK")
</pallas_src>

<mosaic_0001>
module attributes {stable_mosaic.version = 11 : i64} {
  func.func @_basic_block_kernel(%arg0: i32, %arg1: memref<1x16x16x4xf32, #tpu.memory_space<vmem>>, %arg2: memref<1x4xf32, #tpu.memory_space<vmem>>, %arg3: memref<1x4xf32, #tpu.memory_space<vmem>>, %arg4: memref<3x3x4x8xf32, #tpu.memory_space<vmem>>, %arg5: memref<1x8xf32, #tpu.memory_space<vmem>>, %arg6: memref<3x3x8x8xf32, #tpu.memory_space<vmem>>, %arg7: memref<4x8xf32, #tpu.memory_space<vmem>>, %arg8: memref<1x64x8xf32, #tpu.memory_space<vmem>>, %arg9: memref<18x18x4xf32, #tpu.memory_space<vmem>>, %arg10: memref<10x10x8xf32, #tpu.memory_space<vmem>>) attributes {dimension_semantics = [#tpu.dimension_semantics<parallel>], iteration_bounds = array<i64: 2>, scalar_prefetch = 0 : i64, scratch_operands = 2 : i64, tpu.core_type = #tpu.core_type<tc>, window_params = [{transform_indices = @transform_0, window_bounds = array<i64: 1, 16, 16, 4>}, {pipeline_mode = #tpu.pipeline_mode<synchronous>, transform_indices = @transform_1, window_bounds = array<i64: 1, 4>}, {pipeline_mode = #tpu.pipeline_mode<synchronous>, transform_indices = @transform_2, window_bounds = array<i64: 1, 4>}, {pipeline_mode = #tpu.pipeline_mode<synchronous>, transform_indices = @transform_3, window_bounds = array<i64: 3, 3, 4, 8>}, {pipeline_mode = #tpu.pipeline_mode<synchronous>, transform_indices = @transform_4, window_bounds = array<i64: 1, 8>}, {pipeline_mode = #tpu.pipeline_mode<synchronous>, transform_indices = @transform_5, window_bounds = array<i64: 3, 3, 8, 8>}, {pipeline_mode = #tpu.pipeline_mode<synchronous>, transform_indices = @transform_6, window_bounds = array<i64: 4, 8>}, {transform_indices = @transform_7, window_bounds = array<i64: 1, 64, 8>}]} {
    %cst = arith.constant 0.000000e+00 : f32
    %0 = vector.broadcast %cst : f32 to vector<1x18x4xf32>
    %c0 = arith.constant 0 : index
    %c0_0 = arith.constant 0 : index
    %c0_1 = arith.constant 0 : index
    %1 = vector.load %arg9[%c0, %c0_0, %c0_1] : memref<18x18x4xf32, #tpu.memory_space<vmem>>, vector<1x18x4xf32>
    tpu.vector_store %arg9[%c0, %c0_0, %c0_1], %0 {strides = array<i32>} : memref<18x18x4xf32, #tpu.memory_space<vmem>>, vector<1x18x4xf32>,
    %cst_2 = arith.constant 0.000000e+00 : f32
    %2 = vector.broadcast %cst_2 : f32 to vector<1x18x4xf32>
    %c17 = arith.constant 17 : index
    %c0_3 = arith.constant 0 : index
    %c0_4 = arith.constant 0 : index
    %3 = vector.load %arg9[%c17, %c0_3, %c0_4] : memref<18x18x4xf32, #tpu.memory_space<vmem>>, vector<1x18x4xf32>
    tpu.vector_store %arg9[%c17, %c0_3, %c0_4], %2 {strides = array<i32>} : memref<18x18x4xf32, #tpu.memory_space<vmem>>, vector<1x18x4xf32>,
    %cst_5 = arith.constant 0.000000e+00 : f32
    %4 = vector.broadcast %cst_5 : f32 to vector<16x1x4xf32>
    %c1 = arith.constant 1 : index
    %c0_6 = arith.constant 0 : index
    %c0_7 = arith.constant 0 : index
    %5 = vector.load %arg9[%c1, %c0_6, %c0_7] : memref<18x18x4xf32, #tpu.memory_space<vmem>>, vector<16x1x4xf32>
    tpu.vector_store %arg9[%c1, %c0_6, %c0_7], %4 {strides = array<i32>} : memref<18x18x4xf32, #tpu.memory_space<vmem>>, vector<16x1x4xf32>,
    %cst_8 = arith.constant 0.000000e+00 : f32
    %6 = vector.broadcast %cst_8 : f32 to vector<16x1x4xf32>
    %c1_9 = arith.constant 1 : index
    %c17_10 = arith.constant 17 : index
    %c0_11 = arith.constant 0 : index
    %7 = vector.load %arg9[%c1_9, %c17_10, %c0_11] : memref<18x18x4xf32, #tpu.memory_space<vmem>>, vector<16x1x4xf32>
    tpu.vector_store %arg9[%c1_9, %c17_10, %c0_11], %6 {strides = array<i32>} : memref<18x18x4xf32, #tpu.memory_space<vmem>>, vector<16x1x4xf32>,
    %cst_12 = arith.constant 0.000000e+00 : f32
    %8 = vector.broadcast %cst_12 : f32 to vector<1x10x8xf32>
    %c0_13 = arith.constant 0 : index
    %c0_14 = arith.constant 0 : index
    %c0_15 = arith.constant 0 : index
    %9 = vector.load %arg10[%c0_13, %c0_14, %c0_15] : memref<10x10x8xf32, #tpu.memory_space<vmem>>, vector<1x10x8xf32>
    tpu.vector_store %arg10[%c0_13, %c0_14, %c0_15], %8 {strides = array<i32>} : memref<10x10x8xf32, #tpu.memory_space<vmem>>, vector<1x10x8xf32>,
    %cst_16 = arith.constant 0.000000e+00 : f32
    %10 = vector.broadcast %cst_16 : f32 to vector<1x10x8xf32>
    %c9 = arith.constant 9 : index
    %c0_17 = arith.constant 0 : index
    %c0_18 = arith.constant 0 : index
    %11 = vector.load %arg10[%c9, %c0_17, %c0_18] : memref<10x10x8xf32, #tpu.memory_space<vmem>>, vector<1x10x8xf32>
    tpu.vector_store %arg10[%c9, %c0_17, %c0_18], %10 {strides = array<i32>} : memref<10x10x8xf32, #tpu.memory_space<vmem>>, vector<1x10x8xf32>,
    %cst_19 = arith.constant 0.000000e+00 : f32
    %12 = vector.broadcast %cst_19 : f32 to vector<8x1x8xf32>
    %c1_20 = arith.constant 1 : index
    %c0_21 = arith.constant 0 : index
    %c0_22 = arith.constant 0 : index
    %13 = vector.load %arg10[%c1_20, %c0_21, %c0_22] : memref<10x10x8xf32, #tpu.memory_space<vmem>>, vector<8x1x8xf32>
    tpu.vector_store %arg10[%c1_20, %c0_21, %c0_22], %12 {strides = array<i32>} : memref<10x10x8xf32, #tpu.memory_space<vmem>>, vector<8x1x8xf32>,
    %cst_23 = arith.constant 0.000000e+00 : f32
    %14 = vector.broadcast %cst_23 : f32 to vector<8x1x8xf32>
    %c1_24 = arith.constant 1 : index
    %c9_25 = arith.constant 9 : index
    %c0_26 = arith.constant 0 : index
    %15 = vector.load %arg10[%c1_24, %c9_25, %c0_26] : memref<10x10x8xf32, #tpu.memory_space<vmem>>, vector<8x1x8xf32>
    tpu.vector_store %arg10[%c1_24, %c9_25, %c0_26], %14 {strides = array<i32>} : memref<10x10x8xf32, #tpu.memory_space<vmem>>, vector<8x1x8xf32>,
    %c0_27 = arith.constant 0 : index
    %c0_28 = arith.constant 0 : index
    %c0_29 = arith.constant 0 : index
    %c0_30 = arith.constant 0 : index
    %16 = vector.load %arg1[%c0_27, %c0_28, %c0_29, %c0_30] : memref<1x16x16x4xf32, #tpu.memory_space<vmem>>, vector<1x16x16x4xf32>
    %17 = vector.shape_cast %16 : vector<1x16x16x4xf32> to vector<16x16x4xf32>
    %c0_31 = arith.constant 0 : index
    %c0_32 = arith.constant 0 : index
    %18 = vector.load %arg2[%c0_31, %c0_32] : memref<1x4xf32, #tpu.memory_space<vmem>>, vector<1x4xf32>
    %19 = vector.shape_cast %18 : vector<1x4xf32> to vector<1x1x4xf32>
    %20 = vector.broadcast %19 : vector<1x1x4xf32> to vector<16x16x4xf32>
    %21 = arith.mulf %17, %20 : vector<16x16x4xf32>
    %c0_33 = arith.constant 0 : index
    %c0_34 = arith.constant 0 : index
    %22 = vector.load %arg3[%c0_33, %c0_34] : memref<1x4xf32, #tpu.memory_space<vmem>>, vector<1x4xf32>
    %23 = vector.shape_cast %22 : vector<1x4xf32> to vector<1x1x4xf32>
    %24 = vector.broadcast %23 : vector<1x1x4xf32> to vector<16x16x4xf32>
    %25 = arith.addf %21, %24 : vector<16x16x4xf32>
    %cst_35 = arith.constant 0.000000e+00 : f32
    %26 = vector.broadcast %cst_35 : f32 to vector<16x16x4xf32>
    %27 = arith.maximumf %25, %26 : vector<16x16x4xf32>
    %c1_36 = arith.constant 1 : index
    %c1_37 = arith.constant 1 : index
    %c0_38 = arith.constant 0 : index
    %28 = vector.load %arg9[%c1_36, %c1_37, %c0_38] : memref<18x18x4xf32, #tpu.memory_space<vmem>>, vector<16x16x4xf32>
    tpu.vector_store %arg9[%c1_36, %c1_37, %c0_38], %27 {strides = array<i32>} : memref<18x18x4xf32, #tpu.memory_space<vmem>>, vector<16x16x4xf32>,
    %c0_39 = arith.constant 0 : index
    %c0_40 = arith.constant 0 : index
    %c0_41 = arith.constant 0 : index
    %29 = tpu.strided_load %arg9[%c0_39, %c0_40, %c0_41] {strides = array<i32: 2, 2, 1>} : memref<18x18x4xf32, #tpu.memory_space<vmem>>, vector<8x8x4xf32>
    %30 = vector.shape_cast %29 : vector<8x8x4xf32> to vector<64x4xf32>
    %c0_42 = arith.constant 0 : index
    %c0_43 = arith.constant 0 : index
    %c0_44 = arith.constant 0 : index
    %c0_45 = arith.constant 0 : index
    %31 = vector.load %arg4[%c0_42, %c0_43, %c0_44, %c0_45] : memref<3x3x4x8xf32, #tpu.memory_space<vmem>>, vector<1x1x4x8xf32>
    %32 = vector.shape_cast %31 : vector<1x1x4x8xf32> to vector<4x8xf32>
    %cst_46 = arith.constant dense<0.000000e+00> : vector<64x8xf32>
    %33 = tpu.matmul %30, %32, %cst_46 {dimension_numbers = #tpu.dot_dimension_numbers<[1], [0], [0], [1], [0, 0, 1, 1], [], []>} : vector<64x4xf32>, vector<4x8xf32>, vector<64x8xf32> -> vector<64x8xf32>
    %c0_47 = arith.constant 0 : index
    %c1_48 = arith.constant 1 : index
    %c0_49 = arith.constant 0 : index
    %34 = tpu.strided_load %arg9[%c0_47, %c1_48, %c0_49] {strides = array<i32: 2, 2, 1>} : memref<18x18x4xf32, #tpu.memory_space<vmem>>, vector<8x8x4xf32>
    %35 = vector.shape_cast %34 : vector<8x8x4xf32> to vector<64x4xf32>
    %c0_50 = arith.constant 0 : index
    %c1_51 = arith.constant 1 : index
    %c0_52 = arith.constant 0 : index
    %c0_53 = arith.constant 0 : index
    %36 = vector.load %arg4[%c0_50, %c1_51, %c0_52, %c0_53] : memref<3x3x4x8xf32, #tpu.memory_space<vmem>>, vector<1x1x4x8xf32>
    %37 = vector.shape_cast %36 : vector<1x1x4x8xf32> to vector<4x8xf32>
    %cst_54 = arith.constant dense<0.000000e+00> : vector<64x8xf32>
    %38 = tpu.matmul %35, %37, %cst_54 {dimension_numbers = #tpu.dot_dimension_numbers<[1], [0], [0], [1], [0, 0, 1, 1], [], []>} : vector<64x4xf32>, vector<4x8xf32>, vector<64x8xf32> -> vector<64x8xf32>
    %39 = arith.addf %33, %38 : vector<64x8xf32>
    %c0_55 = arith.constant 0 : index
    %c2 = arith.constant 2 : index
    %c0_56 = arith.constant 0 : index
    %40 = tpu.strided_load %arg9[%c0_55, %c2, %c0_56] {strides = array<i32: 2, 2, 1>} : memref<18x18x4xf32, #tpu.memory_space<vmem>>, vector<8x8x4xf32>
    %41 = vector.shape_cast %40 : vector<8x8x4xf32> to vector<64x4xf32>
    %c0_57 = arith.constant 0 : index
    %c2_58 = arith.constant 2 : index
    %c0_59 = arith.constant 0 : index
    %c0_60 = arith.constant 0 : index
    %42 = vector.load %arg4[%c0_57, %c2_58, %c0_59, %c0_60] : memref<3x3x4x8xf32, #tpu.memory_space<vmem>>, vector<1x1x4x8xf32>
    %43 = vector.shape_cast %42 : vector<1x1x4x8xf32> to vector<4x8xf32>
    %cst_61 = arith.constant dense<0.000000e+00> : vector<64x8xf32>
    %44 = tpu.matmul %41, %43, %cst_61 {dimension_numbers = #tpu.dot_dimension_numbers<[1], [0], [0], [1], [0, 0, 1, 1], [], []>} : vector<64x4xf32>, vector<4x8xf32>, vector<64x8xf32> -> vector<64x8xf32>
    %45 = arith.addf %39, %44 : vector<64x8xf32>
    %c1_62 = arith.constant 1 : index
    %c0_63 = arith.constant 0 : index
    %c0_64 = arith.constant 0 : index
    %46 = tpu.strided_load %arg9[%c1_62, %c0_63, %c0_64] {strides = array<i32: 2, 2, 1>} : memref<18x18x4xf32, #tpu.memory_space<vmem>>, vector<8x8x4xf32>
    %47 = vector.shape_cast %46 : vector<8x8x4xf32> to vector<64x4xf32>
    %c1_65 = arith.constant 1 : index
    %c0_66 = arith.constant 0 : index
    %c0_67 = arith.constant 0 : index
    %c0_68 = arith.constant 0 : index
    %48 = vector.load %arg4[%c1_65, %c0_66, %c0_67, %c0_68] : memref<3x3x4x8xf32, #tpu.memory_space<vmem>>, vector<1x1x4x8xf32>
    %49 = vector.shape_cast %48 : vector<1x1x4x8xf32> to vector<4x8xf32>
    %cst_69 = arith.constant dense<0.000000e+00> : vector<64x8xf32>
    %50 = tpu.matmul %47, %49, %cst_69 {dimension_numbers = #tpu.dot_dimension_numbers<[1], [0], [0], [1], [0, 0, 1, 1], [], []>} : vector<64x4xf32>, vector<4x8xf32>, vector<64x8xf32> -> vector<64x8xf32>
    %51 = arith.addf %45, %50 : vector<64x8xf32>
    %c1_70 = arith.constant 1 : index
    %c1_71 = arith.constant 1 : index
    %c0_72 = arith.constant 0 : index
    %52 = tpu.strided_load %arg9[%c1_70, %c1_71, %c0_72] {strides = array<i32: 2, 2, 1>} : memref<18x18x4xf32, #tpu.memory_space<vmem>>, vector<8x8x4xf32>
    %53 = vector.shape_cast %52 : vector<8x8x4xf32> to vector<64x4xf32>
    %c1_73 = arith.constant 1 : index
    %c1_74 = arith.constant 1 : index
    %c0_75 = arith.constant 0 : index
    %c0_76 = arith.constant 0 : index
    %54 = vector.load %arg4[%c1_73, %c1_74, %c0_75, %c0_76] : memref<3x3x4x8xf32, #tpu.memory_space<vmem>>, vector<1x1x4x8xf32>
    %55 = vector.shape_cast %54 : vector<1x1x4x8xf32> to vector<4x8xf32>
    %cst_77 = arith.constant dense<0.000000e+00> : vector<64x8xf32>
    %56 = tpu.matmul %53, %55, %cst_77 {dimension_numbers = #tpu.dot_dimension_numbers<[1], [0], [0], [1], [0, 0, 1, 1], [], []>} : vector<64x4xf32>, vector<4x8xf32>, vector<64x8xf32> -> vector<64x8xf32>
    %57 = arith.addf %51, %56 : vector<64x8xf32>
    %c1_78 = arith.constant 1 : index
    %c2_79 = arith.constant 2 : index
    %c0_80 = arith.constant 0 : index
    %58 = tpu.strided_load %arg9[%c1_78, %c2_79, %c0_80] {strides = array<i32: 2, 2, 1>} : memref<18x18x4xf32, #tpu.memory_space<vmem>>, vector<8x8x4xf32>
    %59 = vector.shape_cast %58 : vector<8x8x4xf32> to vector<64x4xf32>
    %c1_81 = arith.constant 1 : index
    %c2_82 = arith.constant 2 : index
    %c0_83 = arith.constant 0 : index
    %c0_84 = arith.constant 0 : index
    %60 = vector.load %arg4[%c1_81, %c2_82, %c0_83, %c0_84] : memref<3x3x4x8xf32, #tpu.memory_space<vmem>>, vector<1x1x4x8xf32>
    %61 = vector.shape_cast %60 : vector<1x1x4x8xf32> to vector<4x8xf32>
    %cst_85 = arith.constant dense<0.000000e+00> : vector<64x8xf32>
    %62 = tpu.matmul %59, %61, %cst_85 {dimension_numbers = #tpu.dot_dimension_numbers<[1], [0], [0], [1], [0, 0, 1, 1], [], []>} : vector<64x4xf32>, vector<4x8xf32>, vector<64x8xf32> -> vector<64x8xf32>
    %63 = arith.addf %57, %62 : vector<64x8xf32>
    %c2_86 = arith.constant 2 : index
    %c0_87 = arith.constant 0 : index
    %c0_88 = arith.constant 0 : index
    %64 = tpu.strided_load %arg9[%c2_86, %c0_87, %c0_88] {strides = array<i32: 2, 2, 1>} : memref<18x18x4xf32, #tpu.memory_space<vmem>>, vector<8x8x4xf32>
    %65 = vector.shape_cast %64 : vector<8x8x4xf32> to vector<64x4xf32>
    %c2_89 = arith.constant 2 : index
    %c0_90 = arith.constant 0 : index
    %c0_91 = arith.constant 0 : index
    %c0_92 = arith.constant 0 : index
    %66 = vector.load %arg4[%c2_89, %c0_90, %c0_91, %c0_92] : memref<3x3x4x8xf32, #tpu.memory_space<vmem>>, vector<1x1x4x8xf32>
    %67 = vector.shape_cast %66 : vector<1x1x4x8xf32> to vector<4x8xf32>
    %cst_93 = arith.constant dense<0.000000e+00> : vector<64x8xf32>
    %68 = tpu.matmul %65, %67, %cst_93 {dimension_numbers = #tpu.dot_dimension_numbers<[1], [0], [0], [1], [0, 0, 1, 1], [], []>} : vector<64x4xf32>, vector<4x8xf32>, vector<64x8xf32> -> vector<64x8xf32>
    %69 = arith.addf %63, %68 : vector<64x8xf32>
    %c2_94 = arith.constant 2 : index
    %c1_95 = arith.constant 1 : index
    %c0_96 = arith.constant 0 : index
    %70 = tpu.strided_load %arg9[%c2_94, %c1_95, %c0_96] {strides = array<i32: 2, 2, 1>} : memref<18x18x4xf32, #tpu.memory_space<vmem>>, vector<8x8x4xf32>
    %71 = vector.shape_cast %70 : vector<8x8x4xf32> to vector<64x4xf32>
    %c2_97 = arith.constant 2 : index
    %c1_98 = arith.constant 1 : index
    %c0_99 = arith.constant 0 : index
    %c0_100 = arith.constant 0 : index
    %72 = vector.load %arg4[%c2_97, %c1_98, %c0_99, %c0_100] : memref<3x3x4x8xf32, #tpu.memory_space<vmem>>, vector<1x1x4x8xf32>
    %73 = vector.shape_cast %72 : vector<1x1x4x8xf32> to vector<4x8xf32>
    %cst_101 = arith.constant dense<0.000000e+00> : vector<64x8xf32>
    %74 = tpu.matmul %71, %73, %cst_101 {dimension_numbers = #tpu.dot_dimension_numbers<[1], [0], [0], [1], [0, 0, 1, 1], [], []>} : vector<64x4xf32>, vector<4x8xf32>, vector<64x8xf32> -> vector<64x8xf32>
    %75 = arith.addf %69, %74 : vector<64x8xf32>
    %c2_102 = arith.constant 2 : index
    %c2_103 = arith.constant 2 : index
    %c0_104 = arith.constant 0 : index
    %76 = tpu.strided_load %arg9[%c2_102, %c2_103, %c0_104] {strides = array<i32: 2, 2, 1>} : memref<18x18x4xf32, #tpu.memory_space<vmem>>, vector<8x8x4xf32>
    %77 = vector.shape_cast %76 : vector<8x8x4xf32> to vector<64x4xf32>
    %c2_105 = arith.constant 2 : index
    %c2_106 = arith.constant 2 : index
    %c0_107 = arith.constant 0 : index
    %c0_108 = arith.constant 0 : index
    %78 = vector.load %arg4[%c2_105, %c2_106, %c0_107, %c0_108] : memref<3x3x4x8xf32, #tpu.memory_space<vmem>>, vector<1x1x4x8xf32>
    %79 = vector.shape_cast %78 : vector<1x1x4x8xf32> to vector<4x8xf32>
    %cst_109 = arith.constant dense<0.000000e+00> : vector<64x8xf32>
    %80 = tpu.matmul %77, %79, %cst_109 {dimension_numbers = #tpu.dot_dimension_numbers<[1], [0], [0], [1], [0, 0, 1, 1], [], []>} : vector<64x4xf32>, vector<4x8xf32>, vector<64x8xf32> -> vector<64x8xf32>
    %81 = arith.addf %75, %80 : vector<64x8xf32>
    %c0_110 = arith.constant 0 : index
    %c0_111 = arith.constant 0 : index
    %82 = vector.load %arg5[%c0_110, %c0_111] : memref<1x8xf32, #tpu.memory_space<vmem>>, vector<1x8xf32>
    %83 = vector.broadcast %82 : vector<1x8xf32> to vector<64x8xf32>
    %84 = arith.addf %81, %83 : vector<64x8xf32>
    %cst_112 = arith.constant 0.000000e+00 : f32
    %85 = vector.broadcast %cst_112 : f32 to vector<64x8xf32>
    %86 = arith.maximumf %84, %85 : vector<64x8xf32>
    %87 = vector.shape_cast %86 : vector<64x8xf32> to vector<8x8x8xf32>
    %c1_113 = arith.constant 1 : index
    %c1_114 = arith.constant 1 : index
    %c0_115 = arith.constant 0 : index
    %88 = vector.load %arg10[%c1_113, %c1_114, %c0_115] : memref<10x10x8xf32, #tpu.memory_space<vmem>>, vector<8x8x8xf32>
    tpu.vector_store %arg10[%c1_113, %c1_114, %c0_115], %87 {strides = array<i32>} : memref<10x10x8xf32, #tpu.memory_space<vmem>>, vector<8x8x8xf32>,
    %c0_116 = arith.constant 0 : index
    %c0_117 = arith.constant 0 : index
    %c0_118 = arith.constant 0 : index
    %89 = vector.load %arg10[%c0_116, %c0_117, %c0_118] : memref<10x10x8xf32, #tpu.memory_space<vmem>>, vector<8x8x8xf32>
    %90 = vector.shape_cast %89 : vector<8x8x8xf32> to vector<64x8xf32>
    %c0_119 = arith.constant 0 : index
    %c0_120 = arith.constant 0 : index
    %c0_121 = arith.constant 0 : index
    %c0_122 = arith.constant 0 : index
    %91 = vector.load %arg6[%c0_119, %c0_120, %c0_121, %c0_122] : memref<3x3x8x8xf32, #tpu.memory_space<vmem>>, vector<1x1x8x8xf32>
    %92 = vector.shape_cast %91 : vector<1x1x8x8xf32> to vector<8x8xf32>
    %cst_123 = arith.constant dense<0.000000e+00> : vector<64x8xf32>
    %93 = tpu.matmul %90, %92, %cst_123 {dimension_numbers = #tpu.dot_dimension_numbers<[1], [0], [0], [1], [0, 0, 1, 1], [], []>} : vector<64x8xf32>, vector<8x8xf32>, vector<64x8xf32> -> vector<64x8xf32>
    %c0_124 = arith.constant 0 : index
    %c1_125 = arith.constant 1 : index
    %c0_126 = arith.constant 0 : index
    %94 = vector.load %arg10[%c0_124, %c1_125, %c0_126] : memref<10x10x8xf32, #tpu.memory_space<vmem>>, vector<8x8x8xf32>
    %95 = vector.shape_cast %94 : vector<8x8x8xf32> to vector<64x8xf32>
    %c0_127 = arith.constant 0 : index
    %c1_128 = arith.constant 1 : index
    %c0_129 = arith.constant 0 : index
    %c0_130 = arith.constant 0 : index
    %96 = vector.load %arg6[%c0_127, %c1_128, %c0_129, %c0_130] : memref<3x3x8x8xf32, #tpu.memory_space<vmem>>, vector<1x1x8x8xf32>
    %97 = vector.shape_cast %96 : vector<1x1x8x8xf32> to vector<8x8xf32>
    %cst_131 = arith.constant dense<0.000000e+00> : vector<64x8xf32>
    %98 = tpu.matmul %95, %97, %cst_131 {dimension_numbers = #tpu.dot_dimension_numbers<[1], [0], [0], [1], [0, 0, 1, 1], [], []>} : vector<64x8xf32>, vector<8x8xf32>, vector<64x8xf32> -> vector<64x8xf32>
    %99 = arith.addf %93, %98 : vector<64x8xf32>
    %c0_132 = arith.constant 0 : index
    %c2_133 = arith.constant 2 : index
    %c0_134 = arith.constant 0 : index
    %100 = vector.load %arg10[%c0_132, %c2_133, %c0_134] : memref<10x10x8xf32, #tpu.memory_space<vmem>>, vector<8x8x8xf32>
    %101 = vector.shape_cast %100 : vector<8x8x8xf32> to vector<64x8xf32>
    %c0_135 = arith.constant 0 : index
    %c2_136 = arith.constant 2 : index
    %c0_137 = arith.constant 0 : index
    %c0_138 = arith.constant 0 : index
    %102 = vector.load %arg6[%c0_135, %c2_136, %c0_137, %c0_138] : memref<3x3x8x8xf32, #tpu.memory_space<vmem>>, vector<1x1x8x8xf32>
    %103 = vector.shape_cast %102 : vector<1x1x8x8xf32> to vector<8x8xf32>
    %cst_139 = arith.constant dense<0.000000e+00> : vector<64x8xf32>
    %104 = tpu.matmul %101, %103, %cst_139 {dimension_numbers = #tpu.dot_dimension_numbers<[1], [0], [0], [1], [0, 0, 1, 1], [], []>} : vector<64x8xf32>, vector<8x8xf32>, vector<64x8xf32> -> vector<64x8xf32>
    %105 = arith.addf %99, %104 : vector<64x8xf32>
    %c1_140 = arith.constant 1 : index
    %c0_141 = arith.constant 0 : index
    %c0_142 = arith.constant 0 : index
    %106 = vector.load %arg10[%c1_140, %c0_141, %c0_142] : memref<10x10x8xf32, #tpu.memory_space<vmem>>, vector<8x8x8xf32>
    %107 = vector.shape_cast %106 : vector<8x8x8xf32> to vector<64x8xf32>
    %c1_143 = arith.constant 1 : index
    %c0_144 = arith.constant 0 : index
    %c0_145 = arith.constant 0 : index
    %c0_146 = arith.constant 0 : index
    %108 = vector.load %arg6[%c1_143, %c0_144, %c0_145, %c0_146] : memref<3x3x8x8xf32, #tpu.memory_space<vmem>>, vector<1x1x8x8xf32>
    %109 = vector.shape_cast %108 : vector<1x1x8x8xf32> to vector<8x8xf32>
    %cst_147 = arith.constant dense<0.000000e+00> : vector<64x8xf32>
    %110 = tpu.matmul %107, %109, %cst_147 {dimension_numbers = #tpu.dot_dimension_numbers<[1], [0], [0], [1], [0, 0, 1, 1], [], []>} : vector<64x8xf32>, vector<8x8xf32>, vector<64x8xf32> -> vector<64x8xf32>
    %111 = arith.addf %105, %110 : vector<64x8xf32>
    %c1_148 = arith.constant 1 : index
    %c1_149 = arith.constant 1 : index
    %c0_150 = arith.constant 0 : index
    %112 = vector.load %arg10[%c1_148, %c1_149, %c0_150] : memref<10x10x8xf32, #tpu.memory_space<vmem>>, vector<8x8x8xf32>
    %113 = vector.shape_cast %112 : vector<8x8x8xf32> to vector<64x8xf32>
    %c1_151 = arith.constant 1 : index
    %c1_152 = arith.constant 1 : index
    %c0_153 = arith.constant 0 : index
    %c0_154 = arith.constant 0 : index
    %114 = vector.load %arg6[%c1_151, %c1_152, %c0_153, %c0_154] : memref<3x3x8x8xf32, #tpu.memory_space<vmem>>, vector<1x1x8x8xf32>
    %115 = vector.shape_cast %114 : vector<1x1x8x8xf32> to vector<8x8xf32>
    %cst_155 = arith.constant dense<0.000000e+00> : vector<64x8xf32>
    %116 = tpu.matmul %113, %115, %cst_155 {dimension_numbers = #tpu.dot_dimension_numbers<[1], [0], [0], [1], [0, 0, 1, 1], [], []>} : vector<64x8xf32>, vector<8x8xf32>, vector<64x8xf32> -> vector<64x8xf32>
    %117 = arith.addf %111, %116 : vector<64x8xf32>
    %c1_156 = arith.constant 1 : index
    %c2_157 = arith.constant 2 : index
    %c0_158 = arith.constant 0 : index
    %118 = vector.load %arg10[%c1_156, %c2_157, %c0_158] : memref<10x10x8xf32, #tpu.memory_space<vmem>>, vector<8x8x8xf32>
    %119 = vector.shape_cast %118 : vector<8x8x8xf32> to vector<64x8xf32>
    %c1_159 = arith.constant 1 : index
    %c2_160 = arith.constant 2 : index
    %c0_161 = arith.constant 0 : index
    %c0_162 = arith.constant 0 : index
    %120 = vector.load %arg6[%c1_159, %c2_160, %c0_161, %c0_162] : memref<3x3x8x8xf32, #tpu.memory_space<vmem>>, vector<1x1x8x8xf32>
    %121 = vector.shape_cast %120 : vector<1x1x8x8xf32> to vector<8x8xf32>
    %cst_163 = arith.constant dense<0.000000e+00> : vector<64x8xf32>
    %122 = tpu.matmul %119, %121, %cst_163 {dimension_numbers = #tpu.dot_dimension_numbers<[1], [0], [0], [1], [0, 0, 1, 1], [], []>} : vector<64x8xf32>, vector<8x8xf32>, vector<64x8xf32> -> vector<64x8xf32>
    %123 = arith.addf %117, %122 : vector<64x8xf32>
    %c2_164 = arith.constant 2 : index
    %c0_165 = arith.constant 0 : index
    %c0_166 = arith.constant 0 : index
    %124 = vector.load %arg10[%c2_164, %c0_165, %c0_166] : memref<10x10x8xf32, #tpu.memory_space<vmem>>, vector<8x8x8xf32>
    %125 = vector.shape_cast %124 : vector<8x8x8xf32> to vector<64x8xf32>
    %c2_167 = arith.constant 2 : index
    %c0_168 = arith.constant 0 : index
    %c0_169 = arith.constant 0 : index
    %c0_170 = arith.constant 0 : index
    %126 = vector.load %arg6[%c2_167, %c0_168, %c0_169, %c0_170] : memref<3x3x8x8xf32, #tpu.memory_space<vmem>>, vector<1x1x8x8xf32>
    %127 = vector.shape_cast %126 : vector<1x1x8x8xf32> to vector<8x8xf32>
    %cst_171 = arith.constant dense<0.000000e+00> : vector<64x8xf32>
    %128 = tpu.matmul %125, %127, %cst_171 {dimension_numbers = #tpu.dot_dimension_numbers<[1], [0], [0], [1], [0, 0, 1, 1], [], []>} : vector<64x8xf32>, vector<8x8xf32>, vector<64x8xf32> -> vector<64x8xf32>
    %129 = arith.addf %123, %128 : vector<64x8xf32>
    %c2_172 = arith.constant 2 : index
    %c1_173 = arith.constant 1 : index
    %c0_174 = arith.constant 0 : index
    %130 = vector.load %arg10[%c2_172, %c1_173, %c0_174] : memref<10x10x8xf32, #tpu.memory_space<vmem>>, vector<8x8x8xf32>
    %131 = vector.shape_cast %130 : vector<8x8x8xf32> to vector<64x8xf32>
    %c2_175 = arith.constant 2 : index
    %c1_176 = arith.constant 1 : index
    %c0_177 = arith.constant 0 : index
    %c0_178 = arith.constant 0 : index
    %132 = vector.load %arg6[%c2_175, %c1_176, %c0_177, %c0_178] : memref<3x3x8x8xf32, #tpu.memory_space<vmem>>, vector<1x1x8x8xf32>
    %133 = vector.shape_cast %132 : vector<1x1x8x8xf32> to vector<8x8xf32>
    %cst_179 = arith.constant dense<0.000000e+00> : vector<64x8xf32>
    %134 = tpu.matmul %131, %133, %cst_179 {dimension_numbers = #tpu.dot_dimension_numbers<[1], [0], [0], [1], [0, 0, 1, 1], [], []>} : vector<64x8xf32>, vector<8x8xf32>, vector<64x8xf32> -> vector<64x8xf32>
    %135 = arith.addf %129, %134 : vector<64x8xf32>
    %c2_180 = arith.constant 2 : index
    %c2_181 = arith.constant 2 : index
    %c0_182 = arith.constant 0 : index
    %136 = vector.load %arg10[%c2_180, %c2_181, %c0_182] : memref<10x10x8xf32, #tpu.memory_space<vmem>>, vector<8x8x8xf32>
    %137 = vector.shape_cast %136 : vector<8x8x8xf32> to vector<64x8xf32>
    %c2_183 = arith.constant 2 : index
    %c2_184 = arith.constant 2 : index
    %c0_185 = arith.constant 0 : index
    %c0_186 = arith.constant 0 : index
    %138 = vector.load %arg6[%c2_183, %c2_184, %c0_185, %c0_186] : memref<3x3x8x8xf32, #tpu.memory_space<vmem>>, vector<1x1x8x8xf32>
    %139 = vector.shape_cast %138 : vector<1x1x8x8xf32> to vector<8x8xf32>
    %cst_187 = arith.constant dense<0.000000e+00> : vector<64x8xf32>
    %140 = tpu.matmul %137, %139, %cst_187 {dimension_numbers = #tpu.dot_dimension_numbers<[1], [0], [0], [1], [0, 0, 1, 1], [], []>} : vector<64x8xf32>, vector<8x8xf32>, vector<64x8xf32> -> vector<64x8xf32>
    %141 = arith.addf %135, %140 : vector<64x8xf32>
    %c1_188 = arith.constant 1 : index
    %c1_189 = arith.constant 1 : index
    %c0_190 = arith.constant 0 : index
    %142 = tpu.strided_load %arg9[%c1_188, %c1_189, %c0_190] {strides = array<i32: 2, 2, 1>} : memref<18x18x4xf32, #tpu.memory_space<vmem>>, vector<8x8x4xf32>
    %143 = vector.shape_cast %142 : vector<8x8x4xf32> to vector<64x4xf32>
    %c0_191 = arith.constant 0 : index
    %c0_192 = arith.constant 0 : index
    %144 = vector.load %arg7[%c0_191, %c0_192] : memref<4x8xf32, #tpu.memory_space<vmem>>, vector<4x8xf32>
    %cst_193 = arith.constant dense<0.000000e+00> : vector<64x8xf32>
    %145 = tpu.matmul %143, %144, %cst_193 {dimension_numbers = #tpu.dot_dimension_numbers<[1], [0], [0], [1], [0, 0, 1, 1], [], []>} : vector<64x4xf32>, vector<4x8xf32>, vector<64x8xf32> -> vector<64x8xf32>
    %146 = arith.addf %141, %145 : vector<64x8xf32>
    %c0_194 = arith.constant 0 : index
    %c0_195 = arith.constant 0 : index
    %c0_196 = arith.constant 0 : index
    %147 = vector.load %arg8[%c0_194, %c0_195, %c0_196] : memref<1x64x8xf32, #tpu.memory_space<vmem>>, vector<1x64x8xf32>
    %148 = vector.shape_cast %147 : vector<1x64x8xf32> to vector<64x8xf32>
    %149 = vector.shape_cast %146 : vector<64x8xf32> to vector<1x64x8xf32>
    tpu.vector_store %arg8[%c0_194, %c0_195, %c0_196], %149 {strides = array<i32>} : memref<1x64x8xf32, #tpu.memory_space<vmem>>, vector<1x64x8xf32>,
    return
  }
  func.func @transform_0(%arg0: i32) -> (i32, i32, i32, i32) {
    %c0_i32 = arith.constant 0 : i32
    %c0_i32_0 = arith.constant 0 : i32
    %c0_i32_1 = arith.constant 0 : i32
    %c0_i32_2 = arith.constant 0 : i32
    return %arg0, %c0_i32, %c0_i32_0, %c0_i32_1 : i32, i32, i32, i32
  }
  func.func @transform_1(%arg0: i32) -> (i32, i32) {
    %c0_i32 = arith.constant 0 : i32
    %c0_i32_0 = arith.constant 0 : i32
    %c0_i32_1 = arith.constant 0 : i32
    return %c0_i32, %c0_i32_0 : i32, i32
  }
  func.func @transform_2(%arg0: i32) -> (i32, i32) {
    %c0_i32 = arith.constant 0 : i32
    %c0_i32_0 = arith.constant 0 : i32
    %c0_i32_1 = arith.constant 0 : i32
    return %c0_i32, %c0_i32_0 : i32, i32
  }
  func.func @transform_3(%arg0: i32) -> (i32, i32, i32, i32) {
    %c0_i32 = arith.constant 0 : i32
    %c0_i32_0 = arith.constant 0 : i32
    %c0_i32_1 = arith.constant 0 : i32
    %c0_i32_2 = arith.constant 0 : i32
    %c0_i32_3 = arith.constant 0 : i32
    return %c0_i32, %c0_i32_0, %c0_i32_1, %c0_i32_2 : i32, i32, i32, i32
  }
  func.func @transform_4(%arg0: i32) -> (i32, i32) {
    %c0_i32 = arith.constant 0 : i32
    %c0_i32_0 = arith.constant 0 : i32
    %c0_i32_1 = arith.constant 0 : i32
    return %c0_i32, %c0_i32_0 : i32, i32
  }
  func.func @transform_5(%arg0: i32) -> (i32, i32, i32, i32) {
    %c0_i32 = arith.constant 0 : i32
    %c0_i32_0 = arith.constant 0 : i32
    %c0_i32_1 = arith.constant 0 : i32
    %c0_i32_2 = arith.constant 0 : i32
    %c0_i32_3 = arith.constant 0 : i32
    return %c0_i32, %c0_i32_0, %c0_i32_1, %c0_i32_2 : i32, i32, i32, i32
  }
  func.func @transform_6(%arg0: i32) -> (i32, i32) {
    %c0_i32 = arith.constant 0 : i32
    %c0_i32_0 = arith.constant 0 : i32
    %c0_i32_1 = arith.constant 0 : i32
    return %c0_i32, %c0_i32_0 : i32, i32
  }
  func.func @transform_7(%arg0: i32) -> (i32, i32, i32) {
    %c0_i32 = arith.constant 0 : i32
    %c0_i32_0 = arith.constant 0 : i32
    %c0_i32_1 = arith.constant 0 : i32
    return %arg0, %c0_i32, %c0_i32_0 : i32, i32, i32
  }
}

</mosaic_0001>

<bundles_post_ra>
// kernel: tpu_custom_call.1
= control target key start
LH: loop header
LB: loop body
LE: loop exit
PB: predicated region body
PF: predicated region fallthrough
CT: control target
= control target key end

     0   :  { %s4348_s24 = smov 0   ;;  %s4935_s0 = inlined_call_operand.vmem [shape: f32[2,16,16,4], index: 0, kind: input, shape index: {}]   ;;  %s4936_s1 = inlined_call_operand.vmem [shape: f32[1,4], index: 1, kind: input, shape index: {}]   ;;  %s4937_s2 = inlined_call_operand.vmem [shape: f32[1,4], index: 2, kind: input, shape index: {}]   ;;  %s4938_s3 = inlined_call_operand.vmem [shape: f32[3,3,4,8], index: 3, kind: input, shape index: {}]   ;;  %s4939_s4 = inlined_call_operand.vmem [shape: f32[1,8], index: 4, kind: input, shape index: {}]   ;;  %s4940_s5 = inlined_call_operand.vmem [shape: f32[3,3,8,8], index: 5, kind: input, shape index: {}]   ;;  %s4941_s6 = inlined_call_operand.vmem [shape: f32[4,8], index: 6, kind: input, shape index: {}]   ;;  %s4942_s7 = inlined_call_operand.vmem [shape: f32[2,64,8], index: 7, kind: output, shape index: {}]  }
   0x1 LB: > { %s3521_s25 = sadd.s32 4294967295, %s4305_s24   ;;  %p3525_p0 = scmp.ge.s32.totalorder %s4305_s24, 1  ;;  %s4305_s24 = sphi %s4348_s24, %s17_s24  }
   0x2   : > { %p237_p1 = scmp.lt.s32.totalorder %s4305_s24, 3 }
   0x4   : > { %p238_p2 = pnand %p3525_p0, %p237_p1 }
   0x5   : > { %v3532_v0 = vld [vmem:[%s4938_s3 + $0x4] sm:$0xf] (!%p238_p2)  ;;  %vm579_vm0 = vcmask (!%p238_p2), 1043456   ;;  %vm279_vm1 = vcmask (!%p238_p2), 31744   ;;  %p269_p3 = scmp.lt.s32.totalorder (!%p238_p2), %s3521_s25, 1  ;;  %v4307_v1 = vmov (!%p238_p2), 0.0  }
   0x6   : > { %241 = sbr.rel (%p238_p2) target bundleno = 754 (0x2f2), region = 48  ;;  %3886 = vmatprep.subr.msk.mxu0 (!%p238_p2), %vm579_vm0, %v3532_v0  ;;  %280 = vst.msk [vmem:[#allocation2] sm:$0xff] (!%p238_p2), %vm279_vm1, %v4307_v1  ;;  %281 = vst.msk [vmem:[#allocation2 + $0x8] sm:$0xff] (!%p238_p2), %vm279_vm1, %v4307_v1  ;;  %v4367_v2 = vld [vmem:[%s4938_s3] sm:$0xf] (!%p238_p2)  ;;  %vm289_vm2 = vcmask (!%p238_p2), 24576  }
   0x7   : > { %3887 = vmatpush3.msk.msra.mxu0 (!%p238_p2), %vm579_vm0, %v3532_v0  ;;  %vm282_vm3 = vcmask (!%p238_p2), 25600   ;;  %291 = vst.msk [vmem:[#allocation2 + $0x30] sm:$0x1] (!%p238_p2), %vm289_vm2, %v4307_v1  ;;  %290 = vst.msk [vmem:[#allocation2 + $0x18] sm:$0x1] (!%p238_p2), %vm289_vm2, %v4307_v1  ;;  %vm322_vm4 = vcmask (!%p238_p2), 64512  }
   0x8   : > { %3900 = vmatprep.subr.msk.mxu0 (!%p238_p2), %vm579_vm0, %v4367_v2  ;;  %292 = vst.msk [vmem:[#allocation2 + $0x48] sm:$0x1] (!%p238_p2), %vm289_vm2, %v4307_v1  ;;  %293 = vst.msk [vmem:[#allocation2 + $0x60] sm:$0x1] (!%p238_p2), %vm289_vm2, %v4307_v1  ;;  %v4412_v3 = vld [vmem:[%s4936_s1] ss:$0 sm:$0xff] (!%p238_p2) }
   0x9   : > { %294 = vst.msk [vmem:[#allocation2 + $0x78] sm:$0x1] (!%p238_p2), %vm289_vm2, %v4307_v1  ;;  %295 = vst.msk [vmem:[#allocation2 + $0x90] sm:$0x1] (!%p238_p2), %vm289_vm2, %v4307_v1  ;;  %v4422_v4 = vld [vmem:[%s4937_s2] ss:$0 sm:$0xff] (!%p238_p2) }
   0xa   : > { %296 = vst.msk [vmem:[#allocation2 + $0xa8] sm:$0x1] (!%p238_p2), %vm289_vm2, %v4307_v1  ;;  %297 = vst.msk [vmem:[#allocation2 + $0xc0] sm:$0x1] (!%p238_p2), %vm289_vm2, %v4307_v1  ;;  %vm324_vm5 = vcmask (!%p238_p2), 58368   ;;  %vm330_vm6 = vcmask (!%p238_p2), 57344  }
   0xb   : > { %298 = vst.msk [vmem:[#allocation2 + $0xd8] sm:$0x1] (!%p238_p2), %vm289_vm2, %v4307_v1  ;;  %299 = vst.msk [vmem:[#allocation2 + $0xf0] sm:$0x1] (!%p238_p2), %vm289_vm2, %v4307_v1 }
   0xc   : > { %300 = vst.msk [vmem:[#allocation2 + $0x108] sm:$0x1] (!%p238_p2), %vm289_vm2, %v4307_v1  ;;  %301 = vst.msk [vmem:[#allocation2 + $0x120] sm:$0x1] (!%p238_p2), %vm289_vm2, %v4307_v1 }
   0xd   : > { %s4944_s25 = smov (!%p269_p3, %s3521_s25), 1  ;;  %302 = vst.msk [vmem:[#allocation2 + $0x138] sm:$0x1] %vm289_vm2, %v4307_v1  ;;  %303 = vst.msk [vmem:[#allocation2 + $0x150] sm:$0x1] %vm289_vm2, %v4307_v1 }
   0xe   : > { %304 = vst.msk [vmem:[#allocation2 + $0x168] sm:$0x1] %vm289_vm2, %v4307_v1  ;;  %305 = vst.msk [vmem:[#allocation2 + $0x180] sm:$0x1] %vm289_vm2, %v4307_v1  ;;  %s3713_s30 = sshll.u32 %s4944_s25, 8  ;;  %s3714_s9 = sshll.u32 %s4944_s25, 6 }
   0xf   : > { %283 = vst.msk [vmem:[#allocation2 + $0x10] sm:$0x3] %vm282_vm3, %v4307_v1  ;;  %s4417_s12 = scalar_lea.vmem %s4935_s0, %s3713_s30  ;;  %v538_v14 = vld [vmem:[#allocation2 + $0x1] ss:$2 sm:$0xff] }
  0x10   : > { %v349_v5 = vld [vmem:[%s4417_s12 + $0x10] sm:$0xff]  ;;  %v350_v6 = vld [vmem:[%s4417_s12 + $0x18] sm:$0xff]  ;;  %3888 = vmatprep.mubr.msk.f32.mxu0 %vm279_vm1, %v538_v14  ;;  %v347_v42 = vld [vmem:[%s4417_s12] sm:$0xff]  ;;  %323 = vst.msk [vmem:[#allocation3] sm:$0xff] %vm322_vm4, %v4307_v1 }
  0x11   : > { %v353_v7 = vld [vmem:[%s4417_s12 + $0x30] sm:$0xff]  ;;  %v388_v8 = vmul.f32 %v4412_v3, %v349_v5  ;;  %v389_v9 = vmul.f32 %v4412_v3, %v350_v6  ;;  %v354_v10 = vld [vmem:[%s4417_s12 + $0x38] sm:$0xff]  ;;  %v348_v47 = vld [vmem:[%s4417_s12 + $0x8] sm:$0xff]  ;;  %v386_v55 = vmul.f32 %v4412_v3, %v347_v42  ;;  %327 = vst.msk [vmem:[#allocation3 + $0x90] sm:$0xff] %vm322_vm4, %v4307_v1 }
  0x12   : > { %v392_v11 = vmul.f32 %v4412_v3, %v353_v7  ;;  %v357_v12 = vld [vmem:[%s4417_s12 + $0x50] sm:$0xff]  ;;  %v358_v13 = vld [vmem:[%s4417_s12 + $0x58] sm:$0xff]  ;;  %v393_v15 = vmul.f32 %v4412_v3, %v354_v10  ;;  %v351_v56 = vld [vmem:[%s4417_s12 + $0x20] sm:$0xff]  ;;  %v387_v60 = vmul.f32 %v4412_v3, %v348_v47  ;;  %325 = vst.msk [vmem:[#allocation3 + $0x8] sm:$0x3] %vm324_vm5, %v4307_v1 }
  0x13   : > { %v396_v16 = vmul.f32 %v4412_v3, %v357_v12  ;;  %v397_v17 = vmul.f32 %v4412_v3, %v358_v13  ;;  %v361_v18 = vld [vmem:[%s4417_s12 + $0x70] sm:$0xff]  ;;  %v362_v19 = vld [vmem:[%s4417_s12 + $0x78] sm:$0xff]  ;;  %v427_v20 = vadd.f32 %v4422_v4, %v388_v8  ;;  %v428_v21 = vadd.f32 %v4422_v4, %v389_v9  ;;  %v352_v61 = vld [vmem:[%s4417_s12 + $0x28] sm:$0xff]  ;;  %328 = vst.msk [vmem:[#allocation3 + $0x98] sm:$0x3] %vm324_vm5, %v4307_v1 }
  0x14   : > { %v431_v22 = vadd.f32 %v4422_v4, %v392_v11  ;;  %v400_v23 = vmul.f32 %v4412_v3, %v361_v18  ;;  %v432_v24 = vadd.f32 %v4422_v4, %v393_v15  ;;  %v401_v27 = vmul.f32 %v4412_v3, %v362_v19  ;;  %v365_v28 = vld [vmem:[%s4417_s12 + $0x90] sm:$0xff]  ;;  %v366_v29 = vld [vmem:[%s4417_s12 + $0x98] sm:$0xff]  ;;  %v355_v62 = vld [vmem:[%s4417_s12 + $0x40] sm:$0xff]  ;;  %331 = vst.msk [vmem:[#allocation3 + $0x10] sm:$0x1] %vm330_vm6, %v4307_v1 }
  0x15   : > { %v435_v25 = vadd.f32 %v4422_v4, %v396_v16  ;;  %v436_v26 = vadd.f32 %v4422_v4, %v397_v17  ;;  %v369_v30 = vld [vmem:[%s4417_s12 + $0xb0] sm:$0xff]  ;;  %v459_v31 = vmax.f32 %v427_v20, 0.0  ;;  %v460_v32 = vmax.f32 %v428_v21, 0.0  ;;  %v370_v35 = vld [vmem:[%s4417_s12 + $0xb8] sm:$0xff]  ;;  %v356_v63 = vld [vmem:[%s4417_s12 + $0x48] sm:$0xff] }
  0x16   : > { %v463_v33 = vmax.f32 %v431_v22, 0.0  ;;  %v439_v34 = vadd.f32 %v4422_v4, %v400_v23  ;;  %v373_v36 = vld [vmem:[%s4417_s12 + $0xd0] sm:$0xff]  ;;  %v374_v37 = vld [vmem:[%s4417_s12 + $0xd8] sm:$0xff]  ;;  %v464_v38 = vmax.f32 %v432_v24, 0.0  ;;  %v440_v41 = vadd.f32 %v4422_v4, %v401_v27  ;;  %v359_v8 = vld [vmem:[%s4417_s12 + $0x60] sm:$0xff] }
  0x17   : > { %v467_v39 = vmax.f32 %v435_v25, 0.0  ;;  %v468_v40 = vmax.f32 %v436_v26, 0.0  ;;  %491 = vst.msk [vmem:[#allocation2 + $0x31] sm:$0xff] %vm279_vm1, %v459_v31  ;;  %492 = vst.msk [vmem:[#allocation2 + $0x39] sm:$0xff] %vm279_vm1, %v460_v32  ;;  %v404_v44 = vmul.f32 %v4412_v3, %v365_v28  ;;  %v405_v45 = vmul.f32 %v4412_v3, %v366_v29  ;;  %v360_v9 = vld [vmem:[%s4417_s12 + $0x68] sm:$0xff]  ;;  %v363_v10 = vld [vmem:[%s4417_s12 + $0x80] sm:$0xff] }
  0x18   : > { %495 = vst.msk [vmem:[#allocation2 + $0x61] sm:$0xff] %vm279_vm1, %v463_v33  ;;  %v471_v43 = vmax.f32 %v439_v34, 0.0  ;;  %v408_v46 = vmul.f32 %v4412_v3, %v369_v30  ;;  %496 = vst.msk [vmem:[#allocation2 + $0x69] sm:$0xff] %vm279_vm1, %v464_v38  ;;  %v472_v48 = vmax.f32 %v440_v41, 0.0  ;;  %v409_v49 = vmul.f32 %v4412_v3, %v370_v35  ;;  %v364_v15 = vld [vmem:[%s4417_s12 + $0x88] sm:$0xff]  ;;  %v367_v26 = vld [vmem:[%s4417_s12 + $0xa0] sm:$0xff] }
  0x19   : > { %499 = vst.msk [vmem:[#allocation2 + $0x91] sm:$0xff] %vm279_vm1, %v467_v39  ;;  %500 = vst.msk [vmem:[#allocation2 + $0x99] sm:$0xff] %vm279_vm1, %v468_v40  ;;  %v412_v50 = vmul.f32 %v4412_v3, %v373_v36  ;;  %v413_v51 = vmul.f32 %v4412_v3, %v374_v37  ;;  %v443_v52 = vadd.f32 %v4422_v4, %v404_v44  ;;  %v4495_v16 = vld [vmem:[%s4938_s3 + $0x8] sm:$0xf]  ;;  %v371_v37 = vld [vmem:[%s4417_s12 + $0xc0] sm:$0xff] }
  0x1a   : > { %503 = vst.msk [vmem:[#allocation2 + $0xc1] sm:$0xff] %vm279_vm1, %v471_v43  ;;  %v444_v53 = vadd.f32 %v4422_v4, %v405_v45  ;;  %v447_v54 = vadd.f32 %v4422_v4, %v408_v46  ;;  %504 = vst.msk [vmem:[#allocation2 + $0xc9] sm:$0xff] %vm279_vm1, %v472_v48  ;;  %v448_v57 = vadd.f32 %v4422_v4, %v409_v49  ;;  %v368_v27 = vld [vmem:[%s4417_s12 + $0xa8] sm:$0xff]  ;;  %v375_v43 = vld [vmem:[%s4417_s12 + $0xe0] sm:$0xff] }
  0x1b   : > { %v451_v58 = vadd.f32 %v4422_v4, %v412_v50  ;;  %v452_v59 = vadd.f32 %v4422_v4, %v413_v51  ;;  %v475_v0 = vmax.f32 %v443_v52, 0.0  ;;  %v425_v7 = vadd.f32 %v4422_v4, %v386_v55  ;;  %v372_v42 = vld [vmem:[%s4417_s12 + $0xc8] sm:$0xff]  ;;  %v377_v49 = vld [vmem:[%s4417_s12 + $0xf0] sm:$0xff]  ;;  %332 = vst.msk [vmem:[#allocation3 + $0x20] sm:$0x1] %vm330_vm6, %v4307_v1 }
  0x1c   : > { %v476_v5 = vmax.f32 %v444_v53, 0.0  ;;  %v479_v6 = vmax.f32 %v447_v54, 0.0  ;;  %v480_v11 = vmax.f32 %v448_v57, 0.0  ;;  %v426_v14 = vadd.f32 %v4422_v4, %v387_v60  ;;  %v376_v48 = vld [vmem:[%s4417_s12 + $0xe8] sm:$0xff]  ;;  %v378_v54 = vld [vmem:[%s4417_s12 + $0xf8] sm:$0xff]  ;;  %s278_s12 = scalar_lea.vmem %s4942_s7, %s3714_s9 }
  0x1d   : > { %v483_v12 = vmax.f32 %v451_v58, 0.0  ;;  %v484_v13 = vmax.f32 %v452_v59, 0.0  ;;  %507 = vst.msk [vmem:[#allocation2 + $0xf1] sm:$0xff] %vm279_vm1, %v475_v0  ;;  %v457_v17 = vmax.f32 %v425_v7, 0.0  ;;  %v390_v18 = vmul.f32 %v4412_v3, %v351_v56 }
  0x1e   : > { %508 = vst.msk [vmem:[#allocation2 + $0xf9] sm:$0xff] %vm279_vm1, %v476_v5  ;;  %511 = vst.msk [vmem:[#allocation2 + $0x121] sm:$0xff] %vm279_vm1, %v479_v6  ;;  %v391_v19 = vmul.f32 %v4412_v3, %v352_v61  ;;  %v394_v20 = vmul.f32 %v4412_v3, %v355_v62  ;;  %v540_v21 = vld [vmem:[#allocation2 + $0x31] ss:$2 sm:$0xff]  ;;  %v395_v22 = vmul.f32 %v4412_v3, %v356_v63  ;;  %v458_v44 = vmax.f32 %v426_v14, 0.0 }
  0x1f   : > { %512 = vst.msk [vmem:[#allocation2 + $0x129] sm:$0xff] %vm279_vm1, %v480_v11  ;;  %515 = vst.msk [vmem:[#allocation2 + $0x151] sm:$0xff] %vm279_vm1, %v483_v12  ;;  %v398_v23 = vmul.f32 %v4412_v3, %v359_v8  ;;  %v399_v24 = vmul.f32 %v4412_v3, %v360_v9  ;;  %v402_v25 = vmul.f32 %v4412_v3, %v363_v10  ;;  %3889 = vmatmul.mubr.msk.f32.vlgmr.msra.gmra.mrb[0].mxu0 %vm279_vm1, %v540_v21  ;;  %v542_v28 = vld [vmem:[#allocation2 + $0x61] ss:$2 sm:$0xff]  ;;  %v523_v21 = vld [vmem:[#allocation2 + $0x30] ss:$2 sm:$0xff] }
  0x20   : > { %516 = vst.msk [vmem:[#allocation2 + $0x159] sm:$0xff] %vm279_vm1, %v484_v13  ;;  %489 = vst.msk [vmem:[#allocation2 + $0x19] sm:$0xff] %vm279_vm1, %v457_v17  ;;  %v429_v29 = vadd.f32 %v4422_v4, %v390_v18  ;;  %v430_v30 = vadd.f32 %v4422_v4, %v391_v19  ;;  %v433_v31 = vadd.f32 %v4422_v4, %v394_v20  ;;  %3901 = vmatpush3.msk.msra.mxu0 %vm579_vm0, %v4367_v2  ;;  %v544_v33 = vld [vmem:[#allocation2 + $0x91] ss:$2 sm:$0xff]  ;;  %v521_v17 = vld [vmem:[#allocation2] ss:$2 sm:$0xff] }
  0x21   : > { %v403_v32 = vmul.f32 %v4412_v3, %v364_v15  ;;  %3891 = vmatprep.mubr.msk.f32.mxu0 %vm279_vm1, %v542_v28  ;;  %v434_v34 = vadd.f32 %v4422_v4, %v395_v22  ;;  %v437_v35 = vadd.f32 %v4422_v4, %v398_v23  ;;  %v438_v36 = vadd.f32 %v4422_v4, %v399_v24  ;;  %v546_v38 = vld [vmem:[#allocation2 + $0xc1] ss:$2 sm:$0xff]  ;;  %v525_v22 = vld [vmem:[#allocation2 + $0x60] ss:$2 sm:$0xff] }
  0x22   : > { %3914 = vmatprep.subr.msk.mxu0 %vm579_vm0, %v4495_v16  ;;  %v441_v39 = vadd.f32 %v4422_v4, %v402_v25  ;;  %v406_v40 = vmul.f32 %v4412_v3, %v367_v26  ;;  %v407_v41 = vmul.f32 %v4412_v3, %v368_v27  ;;  %v461_v45 = vmax.f32 %v429_v29, 0.0  ;;  %490 = vst.msk [vmem:[#allocation2 + $0x21] sm:$0xff] %vm279_vm1, %v458_v44  ;;  %v3561_v23 = vld [vmem:[%s4938_s3 + $0xc] sm:$0xf]  ;;  %v823_v29 = vld [vmem:[#allocation2 + $0x32] ss:$2 sm:$0xff] }
  0x23   : > { %v442_v2 = vadd.f32 %v4422_v4, %v403_v32  ;;  %v462_v46 = vmax.f32 %v430_v30, 0.0  ;;  %v465_v47 = vmax.f32 %v433_v31, 0.0  ;;  %3892 = vmatmul.mubr.msk.f32.gmra.mrb[2].mxu0 %vm279_vm1, %v544_v33  ;;  %v466_v50 = vmax.f32 %v434_v34, 0.0  ;;  %v529_v25 = vld [vmem:[#allocation2 + $0xc0] ss:$2 sm:$0xff] }
  0x24   : > { %v469_v51 = vmax.f32 %v437_v35, 0.0  ;;  %v470_v52 = vmax.f32 %v438_v36, 0.0  ;;  %v473_v53 = vmax.f32 %v441_v39, 0.0  ;;  %3894 = vmatprep.mubr.msk.f32.mxu0 %vm279_vm1, %v546_v38  ;;  %493 = vst.msk [vmem:[#allocation2 + $0x49] sm:$0xff] %vm279_vm1, %v461_v45  ;;  %v445_v56 = vadd.f32 %v4422_v4, %v406_v40  ;;  %v821_v28 = vld [vmem:[#allocation2 + $0x2] ss:$2 sm:$0xff] }
  0x25   : > { %v548_v55 = vld [vmem:[#allocation2 + $0xf1] ss:$2 sm:$0xff]  ;;  %494 = vst.msk [vmem:[#allocation2 + $0x51] sm:$0xff] %vm279_vm1, %v462_v46  ;;  %497 = vst.msk [vmem:[#allocation2 + $0x79] sm:$0xff] %vm279_vm1, %v465_v47  ;;  %v446_v57 = vadd.f32 %v4422_v4, %v407_v41  ;;  %v410_v58 = vmul.f32 %v4412_v3, %v371_v37  ;;  %v411_v59 = vmul.f32 %v4412_v3, %v372_v42  ;;  %v474_v7 = vmax.f32 %v442_v2, 0.0 }
  0x26   : > { %v550_v60 = vld [vmem:[#allocation2 + $0x121] ss:$2 sm:$0xff]  ;;  %498 = vst.msk [vmem:[#allocation2 + $0x81] sm:$0xff] %vm279_vm1, %v466_v50  ;;  %501 = vst.msk [vmem:[#allocation2 + $0xa9] sm:$0xff] %vm279_vm1, %v469_v51  ;;  %v414_v61 = vmul.f32 %v4412_v3, %v375_v43  ;;  %v415_v62 = vmul.f32 %v4412_v3, %v376_v48  ;;  %v416_v63 = vmul.f32 %v4412_v3, %v377_v49  ;;  %v477_v8 = vmax.f32 %v445_v56, 0.0 }
  0x27   : > { %502 = vst.msk [vmem:[#allocation2 + $0xb1] sm:$0xff] %vm279_vm1, %v470_v52  ;;  %505 = vst.msk [vmem:[#allocation2 + $0xd9] sm:$0xff] %vm279_vm1, %v473_v53  ;;  %v449_v0 = vadd.f32 %v4422_v4, %v410_v58  ;;  %v450_v5 = vadd.f32 %v4422_v4, %v411_v59  ;;  %v417_v6 = vmul.f32 %v4412_v3, %v378_v54  ;;  %3895 = vmatmul.mubr.msk.f32.gmra.mrb[4].mxu0 %vm279_vm1, %v548_v55  ;;  %v552_v11 = vld [vmem:[#allocation2 + $0x151] ss:$2 sm:$0xff]  ;;  %v531_v26 = vld [vmem:[#allocation2 + $0xf0] ss:$2 sm:$0xff] }
  0x28   : > { %v478_v9 = vmax.f32 %v446_v57, 0.0  ;;  %v453_v10 = vadd.f32 %v4422_v4, %v414_v61  ;;  %3897 = vmatprep.mubr.msk.f32.mxu0 %vm279_vm1, %v550_v60  ;;  %v454_v14 = vadd.f32 %v4422_v4, %v415_v62  ;;  %v455_v15 = vadd.f32 %v4422_v4, %v416_v63  ;;  %506 = vst.msk [vmem:[#allocation2 + $0xe1] sm:$0xff] %vm279_vm1, %v474_v7  ;;  %v535_v27 = vld [vmem:[#allocation2 + $0x150] ss:$2 sm:$0xff]  ;;  %v1458_v7 = vld [vmem:[#allocation2 + $0xc0] ss:$2 sm:$0xff] }
  0x29   : > { %v481_v12 = vmax.f32 %v449_v0, 0.0  ;;  %v482_v13 = vmax.f32 %v450_v5, 0.0  ;;  %509 = vst.msk [vmem:[#allocation2 + $0x109] sm:$0xff] %vm279_vm1, %v477_v8  ;;  %v456_v20 = vadd.f32 %v4422_v4, %v417_v6  ;;  %v527_v4 = vld [vmem:[#allocation2 + $0x90] ss:$2 sm:$0xff] }
  0x2a   : > { %510 = vst.msk [vmem:[#allocation2 + $0x111] sm:$0xff] %vm279_vm1, %v478_v9  ;;  %v485_v3 = vmax.f32 %v453_v10, 0.0  ;;  %v486_v18 = vmax.f32 %v454_v14, 0.0  ;;  %v487_v19 = vmax.f32 %v455_v15, 0.0  ;;  %v825_v30 = vld [vmem:[#allocation2 + $0x62] ss:$2 sm:$0xff] }
  0x2b   : > { %513 = vst.msk [vmem:[#allocation2 + $0x139] sm:$0xff] %vm279_vm1, %v481_v12  ;;  %514 = vst.msk [vmem:[#allocation2 + $0x141] sm:$0xff] %vm279_vm1, %v482_v13  ;;  %3898 = vmatmul.mubr.msk.f32.gmra.mrb[6].mxu0 %vm279_vm1, %v552_v11  ;;  %v488_v24 = vmax.f32 %v456_v20, 0.0  ;;  %v3571_v31 = vld [vmem:[%s4938_s3 + $0x10] sm:$0xf] }
  0x2c   : > { %517 = vst.msk [vmem:[#allocation2 + $0x169] sm:$0xff] %vm279_vm1, %v485_v3  ;;  %3902 = vmatprep.mubr.msk.f32.mxu0 %vm279_vm1, %v521_v17  ;;  %518 = vst.msk [vmem:[#allocation2 + $0x171] sm:$0xff] %vm279_vm1, %v486_v18  ;;  %v827_v32 = vld [vmem:[#allocation2 + $0x92] ss:$2 sm:$0xff]  ;;  %v829_v33 = vld [vmem:[#allocation2 + $0xc2] ss:$2 sm:$0xff] }
  0x2d   : > { %519 = vst.msk [vmem:[#allocation2 + $0x181] sm:$0xff] %vm279_vm1, %v487_v19  ;;  %520 = vst.msk [vmem:[#allocation2 + $0x189] sm:$0xff] %vm279_vm1, %v488_v24  ;;  %v831_v34 = vld [vmem:[#allocation2 + $0xf2] ss:$2 sm:$0xff]  ;;  %v833_v35 = vld [vmem:[#allocation2 + $0x122] ss:$2 sm:$0xff] }
  0x2e   : > { %v835_v36 = vld [vmem:[#allocation2 + $0x152] ss:$2 sm:$0xff]  ;;  %v1136_v45 = vld [vmem:[#allocation2 + $0x19] ss:$2 sm:$0xff]  ;;  %v1138_v46 = vld [vmem:[#allocation2 + $0x49] ss:$2 sm:$0xff] }
  0x2f   : > { %3903 = vmatmul.mubr.msk.f32.vlgmr.msra.gmra.mrb[0].mxu0 %vm279_vm1, %v523_v21  ;;  %v978_v37 = vld [vmem:[#allocation2 + $0x18] ss:$2 sm:$0xff]  ;;  %v980_v38 = vld [vmem:[#allocation2 + $0x48] ss:$2 sm:$0xff]  ;;  %v1140_v47 = vld [vmem:[#allocation2 + $0x79] ss:$2 sm:$0xff] }
  0x30   : > { %3915 = vmatpush3.msk.msra.mxu0 %vm579_vm0, %v4495_v16  ;;  %3905 = vmatprep.mubr.msk.f32.mxu0 %vm279_vm1, %v525_v22  ;;  %v533_v16 = vld [vmem:[#allocation2 + $0x120] ss:$2 sm:$0xff]  ;;  %v3581_v2 = vld [vmem:[%s4938_s3 + $0x14] sm:$0xf]  ;;  %v3591_v48 = vld [vmem:[%s4938_s3 + $0x18] sm:$0xf] }
  0x31   : > { %3928 = vmatprep.subr.msk.mxu0 %vm579_vm0, %v3561_v23  ;;  %v982_v39 = vld [vmem:[#allocation2 + $0x78] ss:$2 sm:$0xff]  ;;  %v984_v40 = vld [vmem:[#allocation2 + $0xa8] ss:$2 sm:$0xff]  ;;  %v1142_v49 = vld [vmem:[#allocation2 + $0xa9] ss:$2 sm:$0xff] }
  0x32   : > { %v986_v41 = vld [vmem:[#allocation2 + $0xd8] ss:$2 sm:$0xff]  ;;  %v988_v42 = vld [vmem:[#allocation2 + $0x108] ss:$2 sm:$0xff]  ;;  %v1144_v50 = vld [vmem:[#allocation2 + $0xd9] ss:$2 sm:$0xff] }
  0x33   : > { %3906 = vmatmul.mubr.msk.f32.gmra.mrb[2].mxu0 %vm279_vm1, %v527_v4  ;;  %v990_v43 = vld [vmem:[#allocation2 + $0x138] ss:$2 sm:$0xff]  ;;  %v992_v44 = vld [vmem:[#allocation2 + $0x168] ss:$2 sm:$0xff]  ;;  %v1146_v51 = vld [vmem:[#allocation2 + $0x109] ss:$2 sm:$0xff] }
  0x34   : > { %3908 = vmatprep.mubr.msk.f32.mxu0 %vm279_vm1, %v529_v25  ;;  %v1148_v52 = vld [vmem:[#allocation2 + $0x139] ss:$2 sm:$0xff]  ;;  %v1150_v53 = vld [vmem:[#allocation2 + $0x169] ss:$2 sm:$0xff]  ;;  %v1294_v54 = vld [vmem:[#allocation2 + $0x1a] ss:$2 sm:$0xff] }
  0x35   : > { %v1296_v55 = vld [vmem:[#allocation2 + $0x4a] ss:$2 sm:$0xff]  ;;  %v1298_v56 = vld [vmem:[#allocation2 + $0x7a] ss:$2 sm:$0xff]  ;;  %v1610_v12 = vld [vmem:[#allocation2 + $0x31] ss:$2 sm:$0xff] }
  0x36   : > { %v3601_v57 = vld [vmem:[%s4938_s3 + $0x1c] sm:$0xf]  ;;  %v1300_v58 = vld [vmem:[#allocation2 + $0xaa] ss:$2 sm:$0xff]  ;;  %v3611_v6 = vld [vmem:[%s4938_s3 + $0x20] sm:$0xf] }
  0x37   : > { %3909 = vmatmul.mubr.msk.f32.gmra.mrb[4].mxu0 %vm279_vm1, %v531_v26  ;;  %v1302_v59 = vld [vmem:[#allocation2 + $0xda] ss:$2 sm:$0xff]  ;;  %v1304_v60 = vld [vmem:[#allocation2 + $0x10a] ss:$2 sm:$0xff]  ;;  %v1612_v13 = vld [vmem:[#allocation2 + $0x61] ss:$2 sm:$0xff] }
  0x38   : > { %3911 = vmatprep.mubr.msk.f32.mxu0 %vm279_vm1, %v533_v16  ;;  %v1306_v61 = vld [vmem:[#allocation2 + $0x13a] ss:$2 sm:$0xff]  ;;  %v1308_v62 = vld [vmem:[#allocation2 + $0x16a] ss:$2 sm:$0xff]  ;;  %v1614_v14 = vld [vmem:[#allocation2 + $0x91] ss:$2 sm:$0xff] }
  0x39   : > { %v1452_v63 = vld [vmem:[#allocation2 + $0x30] ss:$2 sm:$0xff]  ;;  %v1454_v0 = vld [vmem:[#allocation2 + $0x60] ss:$2 sm:$0xff]  ;;  %v1616_v15 = vld [vmem:[#allocation2 + $0xc1] ss:$2 sm:$0xff] }
  0x3a   : > { %v1456_v5 = vld [vmem:[#allocation2 + $0x90] ss:$2 sm:$0xff]  ;;  %v1462_v9 = vld [vmem:[#allocation2 + $0x120] ss:$2 sm:$0xff]  ;;  %v1618_v17 = vld [vmem:[#allocation2 + $0xf1] ss:$2 sm:$0xff] }
  0x3b   : > { %3912 = vmatmul.mubr.msk.f32.gmra.mrb[6].mxu0 %vm279_vm1, %v535_v27  ;;  %v1460_v8 = vld [vmem:[#allocation2 + $0xf0] ss:$2 sm:$0xff]  ;;  %v1466_v11 = vld [vmem:[#allocation2 + $0x180] ss:$2 sm:$0xff]  ;;  %v1620_v3 = vld [vmem:[#allocation2 + $0x121] ss:$2 sm:$0xff] }
  0x3c   : > { %3916 = vmatprep.mubr.msk.f32.mxu0 %vm279_vm1, %v821_v28  ;;  %v1464_v10 = vld [vmem:[#allocation2 + $0x150] ss:$2 sm:$0xff]  ;;  %v1622_v18 = vld [vmem:[#allocation2 + $0x151] ss:$2 sm:$0xff]  ;;  %v1624_v19 = vld [vmem:[#allocation2 + $0x181] ss:$2 sm:$0xff] }
  0x3d   : > { %v1768_v20 = vld [vmem:[#allocation2 + $0x32] ss:$2 sm:$0xff]  ;;  %v1770_v21 = vld [vmem:[#allocation2 + $0x62] ss:$2 sm:$0xff]  ;;  %333 = vst.msk [vmem:[#allocation3 + $0x30] sm:$0x1] %vm330_vm6, %v4307_v1 }
  0x3e   : > { %v1772_v22 = vld [vmem:[#allocation2 + $0x92] ss:$2 sm:$0xff]  ;;  %v1778_v4 = vld [vmem:[#allocation2 + $0x122] ss:$2 sm:$0xff]  ;;  %334 = vst.msk [vmem:[#allocation3 + $0x40] sm:$0x1] %vm330_vm6, %v4307_v1 }
  0x3f   : > { %3917 = vmatmul.mubr.msk.f32.vlgmr.msra.gmra.mrb[0].mxu0 %vm279_vm1, %v823_v29  ;;  %v1776_v24 = vld [vmem:[#allocation2 + $0xf2] ss:$2 sm:$0xff]  ;;  %v1782_v26 = vld [vmem:[#allocation2 + $0x182] ss:$2 sm:$0xff]  ;;  %335 = vst.msk [vmem:[#allocation3 + $0x50] sm:$0x1] %vm330_vm6, %v4307_v1 }
  0x40   : > { %3929 = vmatpush3.msk.msra.mxu0 %vm579_vm0, %v3561_v23  ;;  %3919 = vmatprep.mubr.msk.f32.mxu0 %vm279_vm1, %v825_v30  ;;  %v1774_v23 = vld [vmem:[#allocation2 + $0xc2] ss:$2 sm:$0xff]  ;;  %v1780_v25 = vld [vmem:[#allocation2 + $0x152] ss:$2 sm:$0xff]  ;;  %336 = vst.msk [vmem:[#allocation3 + $0x60] sm:$0x1] %vm330_vm6, %v4307_v1 }
  0x41   : > { %3942 = vmatprep.subr.msk.mxu0 %vm579_vm0, %v3571_v31  ;;  %337 = vst.msk [vmem:[#allocation3 + $0x70] sm:$0x1] %vm330_vm6, %v4307_v1  ;;  %338 = vst.msk [vmem:[#allocation3 + $0x80] sm:$0x1] %vm330_vm6, %v4307_v1  ;;  %v3622_v16 = vld [vmem:[%s4940_s5 + $0x8] sm:$0xff]  ;;  %v1965_v27 = vld [vmem:[#allocation3 + $0x1] sm:$0xff] }
  0x42   : > { %339 = vst.msk [vmem:[#allocation3 + $0x19] sm:$0x1] %vm330_vm6, %v4307_v1  ;;  %340 = vst.msk [vmem:[#allocation3 + $0x29] sm:$0x1] %vm330_vm6, %v4307_v1  ;;  %4152 = vmatprep.subr.mxu1 %v3622_v16  ;;  %v1964_v28 = vld [vmem:[%s4940_s5] sm:$0xff] }
  0x43   : > { %3920 = vmatmul.mubr.msk.f32.gmra.mrb[2].mxu0 %vm279_vm1, %v827_v32  ;;  %341 = vst.msk [vmem:[#allocation3 + $0x39] sm:$0x1] %vm330_vm6, %v4307_v1  ;;  %342 = vst.msk [vmem:[#allocation3 + $0x49] sm:$0x1] %vm330_vm6, %v4307_v1  ;;  %4153 = vmatpush3.msra.mxu1 %v3622_v16 }
  0x44   : > { %3922 = vmatprep.mubr.msk.f32.mxu0 %vm279_vm1, %v829_v33  ;;  %343 = vst.msk [vmem:[#allocation3 + $0x59] sm:$0x1] %vm330_vm6, %v4307_v1  ;;  %344 = vst.msk [vmem:[#allocation3 + $0x69] sm:$0x1] %vm330_vm6, %v4307_v1  ;;  %4026 = vmatprep.subr.mxu1 %v1964_v28 }
  0x45   : > { %345 = vst.msk [vmem:[#allocation3 + $0x79] sm:$0x1] %vm330_vm6, %v4307_v1  ;;  %346 = vst.msk [vmem:[#allocation3 + $0x89] sm:$0x1] %vm330_vm6, %v4307_v1  ;;  %v3621_v1 = vld [vmem:[%s4939_s4] ss:$0 sm:$0xff] }
  0x47   : > { %3923 = vmatmul.mubr.msk.f32.gmra.mrb[4].mxu0 %vm279_vm1, %v831_v34 }
  0x48   : > { %3925 = vmatprep.mubr.msk.f32.mxu0 %vm279_vm1, %v833_v35 }
  0x4b   : > { %3926 = vmatmul.mubr.msk.f32.gmra.mrb[6].mxu0 %vm279_vm1, %v835_v36 }
  0x4c   : > { %3930 = vmatprep.mubr.msk.f32.mxu0 %vm279_vm1, %v978_v37 }
  0x4f   : > { %3931 = vmatmul.mubr.msk.f32.vlgmr.msra.gmra.mrb[0].mxu0 %vm279_vm1, %v980_v38 }
  0x50   : > { %3943 = vmatpush3.msk.msra.mxu0 %vm579_vm0, %v3571_v31  ;;  %3933 = vmatprep.mubr.msk.f32.mxu0 %vm279_vm1, %v982_v39 }
  0x51   : > { %3956 = vmatprep.subr.msk.mxu0 %vm579_vm0, %v3581_v2 }
  0x53   : > { %3934 = vmatmul.mubr.msk.f32.gmra.mrb[2].mxu0 %vm279_vm1, %v984_v40 }
  0x54   : > { %3936 = vmatprep.mubr.msk.f32.mxu0 %vm279_vm1, %v986_v41 }
  0x57   : > { %3937 = vmatmul.mubr.msk.f32.gmra.mrb[4].mxu0 %vm279_vm1, %v988_v42 }
  0x58   : > { %3939 = vmatprep.mubr.msk.f32.mxu0 %vm279_vm1, %v990_v43 }
  0x5b   : > { %3940 = vmatmul.mubr.msk.f32.gmra.mrb[6].mxu0 %vm279_vm1, %v992_v44 }
  0x5c   : > { %3944 = vmatprep.mubr.msk.f32.mxu0 %vm279_vm1, %v1136_v45 }
  0x5f   : > { %3945 = vmatmul.mubr.msk.f32.vlgmr.msra.gmra.mrb[0].mxu0 %vm279_vm1, %v1138_v46 }
  0x60   : > { %3957 = vmatpush3.msk.msra.mxu0 %vm579_vm0, %v3581_v2  ;;  %3947 = vmatprep.mubr.msk.f32.mxu0 %vm279_vm1, %v1140_v47 }
  0x61   : > { %3970 = vmatprep.subr.msk.mxu0 %vm579_vm0, %v3591_v48 }
  0x63   : > { %3948 = vmatmul.mubr.msk.f32.gmra.mrb[2].mxu0 %vm279_vm1, %v1142_v49 }
  0x64   : > { %3950 = vmatprep.mubr.msk.f32.mxu0 %vm279_vm1, %v1144_v50 }
  0x67   : > { %3951 = vmatmul.mubr.msk.f32.gmra.mrb[4].mxu0 %vm279_vm1, %v1146_v51 }
  0x68   : > { %3953 = vmatprep.mubr.msk.f32.mxu0 %vm279_vm1, %v1148_v52 }
  0x6b   : > { %3954 = vmatmul.mubr.msk.f32.gmra.mrb[6].mxu0 %vm279_vm1, %v1150_v53 }
  0x6c   : > { %3958 = vmatprep.mubr.msk.f32.mxu0 %vm279_vm1, %v1294_v54 }
  0x6f   : > { %3959 = vmatmul.mubr.msk.f32.vlgmr.msra.gmra.mrb[0].mxu0 %vm279_vm1, %v1296_v55 }
  0x70   : > { %3971 = vmatpush3.msk.msra.mxu0 %vm579_vm0, %v3591_v48  ;;  %3961 = vmatprep.mubr.msk.f32.mxu0 %vm279_vm1, %v1298_v56 }
  0x71   : > { %3984 = vmatprep.subr.msk.mxu0 %vm579_vm0, %v3601_v57 }
  0x73   : > { %3962 = vmatmul.mubr.msk.f32.gmra.mrb[2].mxu0 %vm279_vm1, %v1300_v58 }
  0x74   : > { %3964 = vmatprep.mubr.msk.f32.mxu0 %vm279_vm1, %v1302_v59  ;;  %v1956_v59 = vld [vmem:[#allocation3] sm:$0xff] }
  0x77   : > { %3965 = vmatmul.mubr.msk.f32.gmra.mrb[4].mxu0 %vm279_vm1, %v1304_v60 }
  0x78   : > { %3967 = vmatprep.mubr.msk.f32.mxu0 %vm279_vm1, %v1306_v61 }
  0x7b   : > { %3968 = vmatmul.mubr.msk.f32.gmra.mrb[6].mxu0 %vm279_vm1, %v1308_v62  ;;  %v3648_v62 = vld [vmem:[%s4940_s5 + $0x18] sm:$0xff] }
  0x7c   : > { %3972 = vmatprep.mubr.msk.f32.mxu0 %vm279_vm1, %v1452_v63 }
  0x7f   : > { %3973 = vmatmul.mubr.msk.f32.vlgmr.msra.gmra.mrb[0].mxu0 %vm279_vm1, %v1454_v0 }
  0x80   : > { %3985 = vmatpush3.msk.msra.mxu0 %vm579_vm0, %v3601_v57  ;;  %3975 = vmatprep.mubr.msk.f32.mxu0 %vm279_vm1, %v1456_v5  ;;  %v3639_v57 = vld [vmem:[%s4940_s5 + $0x10] sm:$0xff] }
  0x81   : > { %3998 = vmatprep.subr.msk.mxu0 %vm579_vm0, %v3611_v6 }
  0x83   : > { %3976 = vmatmul.mubr.msk.f32.gmra.mrb[2].mxu0 %vm279_vm1, %v1458_v7 }
  0x84   : > { %3978 = vmatprep.mubr.msk.f32.mxu0 %vm279_vm1, %v1460_v8  ;;  %v2233_v8 = vld [vmem:[#allocation3 + $0x2] sm:$0xff] }
  0x87   : > { %3979 = vmatmul.mubr.msk.f32.gmra.mrb[4].mxu0 %vm279_vm1, %v1462_v9 }
  0x88   : > { %3981 = vmatprep.mubr.msk.f32.mxu0 %vm279_vm1, %v1464_v10 }
  0x8b   : > { %3982 = vmatmul.mubr.msk.f32.gmra.mrb[6].mxu0 %vm279_vm1, %v1466_v11  ;;  %v3657_v11 = vld [vmem:[%s4940_s5 + $0x20] sm:$0xff] }
  0x8c   : > { %3986 = vmatprep.mubr.msk.f32.mxu0 %vm279_vm1, %v1610_v12 }
  0x8f   : > { %3987 = vmatmul.mubr.msk.f32.vlgmr.msra.gmra.mrb[0].mxu0 %vm279_vm1, %v1612_v13 }
  0x90   : > { %3999 = vmatpush3.msk.msra.mxu0 %vm579_vm0, %v3611_v6  ;;  %3989 = vmatprep.mubr.msk.f32.mxu0 %vm279_vm1, %v1614_v14 }
  0x91   : > { %4012 = vmatprep.subr.mxu0 %v3622_v16 }
  0x93   : > { %3990 = vmatmul.mubr.msk.f32.gmra.mrb[2].mxu0 %vm279_vm1, %v1616_v15 }
  0x94   : > { %3992 = vmatprep.mubr.msk.f32.mxu0 %vm279_vm1, %v1618_v17 }
  0x97   : > { %3993 = vmatmul.mubr.msk.f32.gmra.mrb[4].mxu0 %vm279_vm1, %v1620_v3 }
  0x98   : > { %3995 = vmatprep.mubr.msk.f32.mxu0 %vm279_vm1, %v1622_v18  ;;  %v3666_v18 = vld [vmem:[%s4940_s5 + $0x28] sm:$0xff] }
  0x9b   : > { %3996 = vmatmul.mubr.msk.f32.gmra.mrb[6].mxu0 %vm279_vm1, %v1624_v19 }
  0x9c   : > { %4000 = vmatprep.mubr.msk.f32.mxu0 %vm279_vm1, %v1768_v20  ;;  %v3675_v20 = vld [vmem:[%s4940_s5 + $0x30] sm:$0xff] }
  0x9f   : > { %4001 = vmatmul.mubr.msk.f32.vlgmr.msra.gmra.mrb[0].mxu0 %vm279_vm1, %v1770_v21 }
  0xa0   : > { %4003 = vmatprep.mubr.msk.f32.mxu0 %vm279_vm1, %v1772_v22  ;;  %4013 = vmatpush3.msra.mxu0 %v3622_v16  ;;  %v3684_v22 = vld [vmem:[%s4940_s5 + $0x38] sm:$0xff]  ;;  %v3123_v16 = vld [vmem:[#allocation3 + $0x92] sm:$0xff] }
  0xa3   : > { %4004 = vmatmul.mubr.msk.f32.gmra.mrb[2].mxu0 %vm279_vm1, %v1774_v23 }
  0xa4   : > { %4006 = vmatprep.mubr.msk.f32.mxu0 %vm279_vm1, %v1776_v24  ;;  %v3693_v24 = vld [vmem:[%s4940_s5 + $0x40] sm:$0xff] }
  0xa7   : > { %4007 = vmatmul.mubr.msk.f32.gmra.mrb[4].mxu0 %vm279_vm1, %v1778_v4  ;;  %v2829_v4 = vld [vmem:[#allocation3 + $0x90] sm:$0xff] }
  0xa8   : > { %4009 = vmatprep.mubr.msk.f32.mxu0 %vm279_vm1, %v1780_v25  ;;  %v3271_v25 = vld [vmem:[%s4941_s6] sm:$0xf] }
  0xab   : > { %4010 = vmatmul.mubr.msk.f32.gmra.mrb[6].mxu0 %vm279_vm1, %v1782_v26  ;;  %v2976_v26 = vld [vmem:[#allocation3 + $0x91] sm:$0xff] }
  0xac   : > { %4014 = vmatprep.mubr.msk.f32.mxu0 %vm322_vm4, %v1965_v27  ;;  %v3263_v27 = vld [vmem:[#allocation2 + $0x19] ss:$2 sm:$0xff] }
 0x172   : > { %v4002_v29 = vpop.f32.mrb[0].mxu0 }
 0x173   : > { %v1933_v30 = vadd.f32 %v4002_v29, %v3621_v1  ;;  %v1878_v31 = vpop.f32.mrb[1].mxu0  ;;  %v3266_v29 = vld [vmem:[#allocation2 + $0xa9] ss:$2 sm:$0xff] }
 0x174   : > { %v1932_v32 = vadd.f32 %v3621_v1, %v1878_v31  ;;  %v3268_v31 = vld [vmem:[#allocation2 + $0x109] ss:$2 sm:$0xff] }
 0x175   : > { %v1941_v33 = vmax.f32 %v1933_v30, 0.0  ;;  %v3267_v30 = vld [vmem:[#allocation2 + $0xd9] ss:$2 sm:$0xff] }
 0x176   : > { %v1940_v34 = vmax.f32 %v1932_v32, 0.0  ;;  %v4005_v35 = vpop.f32.mrb[2].mxu0  ;;  %v3269_v32 = vld [vmem:[#allocation2 + $0x139] ss:$2 sm:$0xff] }
 0x177   : > { %1949 = vst.msk [vmem:[#allocation3 + $0x21] sm:$0xff] %vm322_vm4, %v1941_v33  ;;  %v1935_v36 = vadd.f32 %v4005_v35, %v3621_v1  ;;  %v1888_v37 = vpop.f32.mrb[3].mxu0  ;;  %v3270_v33 = vld [vmem:[#allocation2 + $0x169] ss:$2 sm:$0xff] }
 0x178   : > { %1948 = vst.msk [vmem:[#allocation3 + $0x11] sm:$0xff] %vm322_vm4, %v1940_v34  ;;  %v1934_v38 = vadd.f32 %v3621_v1, %v1888_v37 }
 0x179   : > { %v1943_v39 = vmax.f32 %v1935_v36, 0.0 }
 0x17a   : > { %v1942_v2 = vmax.f32 %v1934_v38, 0.0  ;;  %v4008_v40 = vpop.f32.mrb[4].mxu0 }
 0x17b   : > { %1951 = vst.msk [vmem:[#allocation3 + $0x41] sm:$0xff] %vm322_vm4, %v1943_v39  ;;  %v1937_v41 = vadd.f32 %v4008_v40, %v3621_v1  ;;  %v1898_v42 = vpop.f32.mrb[5].mxu0 }
 0x17c   : > { %1950 = vst.msk [vmem:[#allocation3 + $0x31] sm:$0xff] %vm322_vm4, %v1942_v2  ;;  %v1936_v43 = vadd.f32 %v3621_v1, %v1898_v42 }
 0x17d   : > { %v1945_v44 = vmax.f32 %v1937_v41, 0.0 }
 0x17e   : > { %v1944_v45 = vmax.f32 %v1936_v43, 0.0  ;;  %v4011_v46 = vpop.f32.mrb[6].mxu0  ;;  %v4723_v51 = vld [vmem:[#allocation3 + $0x21] sm:$0xff] }
 0x17f   : > { %1953 = vst.msk [vmem:[#allocation3 + $0x61] sm:$0xff] %vm322_vm4, %v1945_v44  ;;  %v1939_v47 = vadd.f32 %v4011_v46, %v3621_v1  ;;  %v1908_v48 = vpop.f32.mrb[7].mxu0  ;;  %v4718_v49 = vld [vmem:[#allocation3 + $0x11] sm:$0xff]  ;;  %v4757_v63 = vld [vmem:[#allocation3 + $0x20] sm:$0xff] }
 0x180   : > { %1952 = vst.msk [vmem:[#allocation3 + $0x51] sm:$0xff] %vm322_vm4, %v1944_v45  ;;  %v1938_v50 = vadd.f32 %v3621_v1, %v1908_v48  ;;  %4015 = vmatmul.mubr.msk.f32.vlgmr.msra.gmra.mrb[8].mxu0 %vm322_vm4, %v4718_v49  ;;  %v1957_v61 = vld [vmem:[#allocation3 + $0x10] sm:$0xff]  ;;  %v4786_v12 = vld [vmem:[#allocation3 + $0x22] sm:$0xff] }
 0x181   : > { %v1947_v52 = vmax.f32 %v1939_v47, 0.0  ;;  %4017 = vmatprep.mubr.msk.f32.mxu0 %vm322_vm4, %v4723_v51  ;;  %v2234_v10 = vld [vmem:[#allocation3 + $0x12] sm:$0xff] }
 0x182   : > { %v1946_v53 = vmax.f32 %v1938_v50, 0.0  ;;  %v4727_v54 = vld [vmem:[#allocation3 + $0x41] sm:$0xff]  ;;  %v3265_v1 = vld [vmem:[#allocation2 + $0x79] ss:$2 sm:$0xff] }
 0x183   : > { %1955 = vst.msk [vmem:[#allocation3 + $0x81] sm:$0xff] %vm322_vm4, %v1947_v52  ;;  %4020 = vmatprep.mubr.msk.f32.mxu1 %vm322_vm4, %v4727_v54  ;;  %v4732_v55 = vld [vmem:[#allocation3 + $0x31] sm:$0xff]  ;;  %v4765_v5 = vld [vmem:[#allocation3 + $0x40] sm:$0xff] }
 0x184   : > { %1954 = vst.msk [vmem:[#allocation3 + $0x71] sm:$0xff] %vm322_vm4, %v1946_v53  ;;  %4018 = vmatmul.mubr.msk.f32.gmra.mrb[10].mxu0 %vm322_vm4, %v4732_v55  ;;  %v4761_v0 = vld [vmem:[#allocation3 + $0x30] sm:$0xff]  ;;  %v4794_v14 = vld [vmem:[#allocation3 + $0x42] sm:$0xff] }
 0x185   : > { %v4790_v13 = vld [vmem:[#allocation3 + $0x32] sm:$0xff] }
 0x186   : > { %v4744_v58 = vld [vmem:[#allocation3 + $0x61] sm:$0xff] }
 0x187   : > { %v4737_v56 = vld [vmem:[#allocation3 + $0x51] sm:$0xff]  ;;  %v4773_v7 = vld [vmem:[#allocation3 + $0x60] sm:$0xff] }
 0x188   : > { %4021 = vmatmul.mubr.msk.f32.vlgmr.msra.gmra.mrb[0].mxu1 %vm322_vm4, %v4737_v56  ;;  %v4769_v6 = vld [vmem:[#allocation3 + $0x50] sm:$0xff]  ;;  %v4802_v17 = vld [vmem:[#allocation3 + $0x62] sm:$0xff] }
 0x189   : > { %4027 = vmatpush3.msra.mxu1 %v1964_v28  ;;  %4023 = vmatprep.mubr.msk.f32.mxu1 %vm322_vm4, %v4744_v58  ;;  %v4798_v15 = vld [vmem:[#allocation3 + $0x52] sm:$0xff] }
 0x18a   : > { %4040 = vmatprep.subr.mxu1 %v3639_v57  ;;  %v2387_v19 = vld [vmem:[#allocation3 + $0x80] sm:$0xff] }
 0x18b   : > { %v4748_v60 = vld [vmem:[#allocation3 + $0x71] sm:$0xff]  ;;  %v2534_v21 = vld [vmem:[#allocation3 + $0x81] sm:$0xff] }
 0x18c   : > { %4024 = vmatmul.mubr.msk.f32.gmra.mrb[2].mxu1 %vm322_vm4, %v4748_v60  ;;  %v4777_v9 = vld [vmem:[#allocation3 + $0x70] sm:$0xff]  ;;  %v2681_v23 = vld [vmem:[#allocation3 + $0x82] sm:$0xff] }
 0x18d   : > { %4028 = vmatprep.mubr.msk.f32.mxu1 %vm322_vm4, %v1956_v59  ;;  %v4806_v3 = vld [vmem:[#allocation3 + $0x72] sm:$0xff] }
 0x18e   : > { %v3264_v28 = vld [vmem:[#allocation2 + $0x49] ss:$2 sm:$0xff] }
 0x190   : > { %4029 = vmatmul.mubr.msk.f32.vlgmr.msra.gmra.mrb[4].mxu1 %vm322_vm4, %v1957_v61 }
 0x191   : > { %4041 = vmatpush3.msra.mxu1 %v3639_v57  ;;  %4031 = vmatprep.mubr.msk.f32.mxu1 %vm322_vm4, %v4757_v63 }
 0x192   : > { %4054 = vmatprep.subr.mxu1 %v3648_v62 }
 0x194   : > { %4032 = vmatmul.mubr.msk.f32.gmra.mrb[6].mxu1 %vm322_vm4, %v4761_v0 }
 0x195   : > { %4034 = vmatprep.mubr.msk.f32.mxu1 %vm322_vm4, %v4765_v5 }
 0x198   : > { %4035 = vmatmul.mubr.msk.f32.gmra.mrb[0].mxu1 %vm322_vm4, %v4769_v6 }
 0x199   : > { %4037 = vmatprep.mubr.msk.f32.mxu1 %vm322_vm4, %v4773_v7 }
 0x19c   : > { %4038 = vmatmul.mubr.msk.f32.gmra.mrb[2].mxu1 %vm322_vm4, %v4777_v9 }
 0x19d   : > { %4042 = vmatprep.mubr.msk.f32.mxu1 %vm322_vm4, %v2233_v8 }
 0x1a0   : > { %4043 = vmatmul.mubr.msk.f32.vlgmr.msra.gmra.mrb[4].mxu1 %vm322_vm4, %v2234_v10 }
 0x1a1   : > { %4055 = vmatpush3.msra.mxu1 %v3648_v62  ;;  %4045 = vmatprep.mubr.msk.f32.mxu1 %vm322_vm4, %v4786_v12 }
 0x1a2   : > { %4068 = vmatprep.subr.mxu1 %v3657_v11 }
 0x1a4   : > { %4046 = vmatmul.mubr.msk.f32.gmra.mrb[6].mxu1 %vm322_vm4, %v4790_v13 }
 0x1a5   : > { %4048 = vmatprep.mubr.msk.f32.mxu1 %vm322_vm4, %v4794_v14 }
 0x1a8   : > { %4049 = vmatmul.mubr.msk.f32.gmra.mrb[0].mxu1 %vm322_vm4, %v4798_v15 }
 0x1a9   : > { %4051 = vmatprep.mubr.msk.f32.mxu1 %vm322_vm4, %v4802_v17 }
 0x1ac   : > { %4052 = vmatmul.mubr.msk.f32.gmra.mrb[2].mxu1 %vm322_vm4, %v4806_v3 }
 0x1ad   : > { %4056 = vmatprep.mubr.msk.f32.mxu1 %vm322_vm4, %v1957_v61 }
 0x1b0   : > { %4057 = vmatmul.mubr.msk.f32.vlgmr.msra.gmra.mrb[4].mxu1 %vm322_vm4, %v4757_v63 }
 0x1b1   : > { %4069 = vmatpush3.msra.mxu1 %v3657_v11  ;;  %4059 = vmatprep.mubr.msk.f32.mxu1 %vm322_vm4, %v4761_v0 }
 0x1b2   : > { %4082 = vmatprep.subr.mxu1 %v3666_v18 }
 0x1b4   : > { %4060 = vmatmul.mubr.msk.f32.gmra.mrb[6].mxu1 %vm322_vm4, %v4765_v5 }
 0x1b5   : > { %4062 = vmatprep.mubr.msk.f32.mxu1 %vm322_vm4, %v4769_v6 }
 0x1b8   : > { %4063 = vmatmul.mubr.msk.f32.gmra.mrb[0].mxu1 %vm322_vm4, %v4773_v7 }
 0x1b9   : > { %4065 = vmatprep.mubr.msk.f32.mxu1 %vm322_vm4, %v4777_v9 }
 0x1bc   : > { %4066 = vmatmul.mubr.msk.f32.gmra.mrb[2].mxu1 %vm322_vm4, %v2387_v19 }
 0x1bd   : > { %4070 = vmatprep.mubr.msk.f32.mxu1 %vm322_vm4, %v4718_v49 }
 0x1c0   : > { %4071 = vmatmul.mubr.msk.f32.vlgmr.msra.gmra.mrb[4].mxu1 %vm322_vm4, %v4723_v51 }
 0x1c1   : > { %4083 = vmatpush3.msra.mxu1 %v3666_v18  ;;  %4073 = vmatprep.mubr.msk.f32.mxu1 %vm322_vm4, %v4732_v55 }
 0x1c2   : > { %4096 = vmatprep.subr.mxu1 %v3675_v20 }
 0x1c4   : > { %4074 = vmatmul.mubr.msk.f32.gmra.mrb[6].mxu1 %vm322_vm4, %v4727_v54 }
 0x1c5   : > { %4076 = vmatprep.mubr.msk.f32.mxu1 %vm322_vm4, %v4737_v56 }
 0x1c8   : > { %4077 = vmatmul.mubr.msk.f32.gmra.mrb[0].mxu1 %vm322_vm4, %v4744_v58 }
 0x1c9   : > { %4079 = vmatprep.mubr.msk.f32.mxu1 %vm322_vm4, %v4748_v60 }
 0x1cc   : > { %4080 = vmatmul.mubr.msk.f32.gmra.mrb[2].mxu1 %vm322_vm4, %v2534_v21 }
 0x1cd   : > { %4084 = vmatprep.mubr.msk.f32.mxu1 %vm322_vm4, %v2234_v10 }
 0x1d0   : > { %4085 = vmatmul.mubr.msk.f32.vlgmr.msra.gmra.mrb[4].mxu1 %vm322_vm4, %v4786_v12 }
 0x1d1   : > { %4097 = vmatpush3.msra.mxu1 %v3675_v20  ;;  %4087 = vmatprep.mubr.msk.f32.mxu1 %vm322_vm4, %v4790_v13 }
 0x1d2   : > { %4110 = vmatprep.subr.mxu1 %v3684_v22 }
 0x1d4   : > { %4088 = vmatmul.mubr.msk.f32.gmra.mrb[6].mxu1 %vm322_vm4, %v4794_v14 }
 0x1d5   : > { %4090 = vmatprep.mubr.msk.f32.mxu1 %vm322_vm4, %v4798_v15 }
 0x1d8   : > { %4091 = vmatmul.mubr.msk.f32.gmra.mrb[0].mxu1 %vm322_vm4, %v4802_v17 }
 0x1d9   : > { %4093 = vmatprep.mubr.msk.f32.mxu1 %vm322_vm4, %v4806_v3 }
 0x1dc   : > { %4094 = vmatmul.mubr.msk.f32.gmra.mrb[2].mxu1 %vm322_vm4, %v2681_v23 }
 0x1dd   : > { %4098 = vmatprep.mubr.msk.f32.mxu1 %vm322_vm4, %v4757_v63 }
 0x1e0   : > { %4099 = vmatmul.mubr.msk.f32.vlgmr.msra.gmra.mrb[4].mxu1 %vm322_vm4, %v4761_v0 }
 0x1e1   : > { %4111 = vmatpush3.msra.mxu1 %v3684_v22  ;;  %4101 = vmatprep.mubr.msk.f32.mxu1 %vm322_vm4, %v4765_v5 }
 0x1e2   : > { %4124 = vmatprep.subr.mxu1 %v3693_v24 }
 0x1e4   : > { %4102 = vmatmul.mubr.msk.f32.gmra.mrb[6].mxu1 %vm322_vm4, %v4769_v6 }
 0x1e5   : > { %4104 = vmatprep.mubr.msk.f32.mxu1 %vm322_vm4, %v4773_v7 }
 0x1e8   : > { %4105 = vmatmul.mubr.msk.f32.gmra.mrb[0].mxu1 %vm322_vm4, %v4777_v9 }
 0x1e9   : > { %4107 = vmatprep.mubr.msk.f32.mxu1 %vm322_vm4, %v2387_v19 }
 0x1ec   : > { %4108 = vmatmul.mubr.msk.f32.gmra.mrb[2].mxu1 %vm322_vm4, %v2829_v4 }
 0x1ed   : > { %4112 = vmatprep.mubr.msk.f32.mxu1 %vm322_vm4, %v4723_v51 }
 0x1f0   : > { %4113 = vmatmul.mubr.msk.f32.vlgmr.msra.gmra.mrb[4].mxu1 %vm322_vm4, %v4732_v55 }
 0x1f1   : > { %4125 = vmatpush3.msra.mxu1 %v3693_v24  ;;  %4115 = vmatprep.mubr.msk.f32.mxu1 %vm322_vm4, %v4727_v54 }
 0x1f2   : > { %4138 = vmatprep.subr.msk.mxu1 %vm579_vm0, %v3271_v25 }
 0x1f4   : > { %4116 = vmatmul.mubr.msk.f32.gmra.mrb[6].mxu1 %vm322_vm4, %v4737_v56 }
 0x1f5   : > { %4118 = vmatprep.mubr.msk.f32.mxu1 %vm322_vm4, %v4744_v58 }
 0x1f8   : > { %4119 = vmatmul.mubr.msk.f32.gmra.mrb[0].mxu1 %vm322_vm4, %v4748_v60 }
 0x1f9   : > { %4121 = vmatprep.mubr.msk.f32.mxu1 %vm322_vm4, %v2534_v21 }
 0x1fc   : > { %4122 = vmatmul.mubr.msk.f32.gmra.mrb[2].mxu1 %vm322_vm4, %v2976_v26 }
 0x1fd   : > { %4126 = vmatprep.mubr.msk.f32.mxu1 %vm322_vm4, %v4786_v12 }
 0x200   : > { %4127 = vmatmul.mubr.msk.f32.vlgmr.msra.gmra.mrb[4].mxu1 %vm322_vm4, %v4790_v13 }
 0x201   : > { %4139 = vmatpush3.msk.msra.mxu1 %vm579_vm0, %v3271_v25  ;;  %4129 = vmatprep.mubr.msk.f32.mxu1 %vm322_vm4, %v4794_v14 }
 0x204   : > { %4130 = vmatmul.mubr.msk.f32.gmra.mrb[6].mxu1 %vm322_vm4, %v4798_v15 }
 0x205   : > { %4132 = vmatprep.mubr.msk.f32.mxu1 %vm322_vm4, %v4802_v17 }
 0x208   : > { %4133 = vmatmul.mubr.msk.f32.gmra.mrb[0].mxu1 %vm322_vm4, %v4806_v3 }
 0x209   : > { %4135 = vmatprep.mubr.msk.f32.mxu1 %vm322_vm4, %v2681_v23 }
 0x20c   : > { %4136 = vmatmul.mubr.msk.f32.gmra.mrb[2].mxu1 %vm322_vm4, %v3123_v16 }
 0x20d   : > { %4140 = vmatprep.mubr.msk.f32.mxu1 %vm279_vm1, %v3263_v27 }
 0x210   : > { %4141 = vmatmul.mubr.msk.f32.vlgmr.msra.gmra.mrb[4].mxu1 %vm279_vm1, %v3264_v28 }
 0x211   : > { %4143 = vmatprep.mubr.msk.f32.mxu1 %vm279_vm1, %v3265_v1 }
 0x214   : > { %4144 = vmatmul.mubr.msk.f32.gmra.mrb[6].mxu1 %vm279_vm1, %v3266_v29 }
 0x215   : > { %4146 = vmatprep.mubr.msk.f32.mxu1 %vm279_vm1, %v3267_v30 }
 0x218   : > { %4147 = vmatmul.mubr.msk.f32.gmra.mrb[0].mxu1 %vm279_vm1, %v3268_v31 }
 0x219   : > { %4149 = vmatprep.mubr.msk.f32.mxu1 %vm279_vm1, %v3269_v32 }
 0x21c   : > { %4150 = vmatmul.mubr.msk.f32.gmra.mrb[2].mxu1 %vm279_vm1, %v3270_v33 }
 0x253   : > { %v4016_v34 = vpop.f32.mrb[8].mxu0 }
 0x254   : > { %v2065_v35 = vpop.f32.mrb[9].mxu0 }
 0x257   : > { %v4019_v36 = vpop.f32.mrb[10].mxu0 }
 0x258   : > { %v2075_v37 = vpop.f32.mrb[11].mxu0 }
 0x2e3   : > { %v4142_v38 = vpop.f32.mrb[4].mxu1 }
 0x2e4   : > { %v4154_v39 = vadd.f32 %v4142_v38, %v4016_v34  ;;  %v3365_v2 = vpop.f32.mrb[5].mxu1 }
 0x2e5   : > { %v4155_v40 = vadd.f32 %v3365_v2, %v2065_v35 }
 0x2e6   : > { %3413 = vst.msk [vmem:[%s278_s12 + $0x8] sm:$0xff] %vm322_vm4, %v4154_v39 }
 0x2e7   : > { %3412 = vst.msk [vmem:[%s278_s12] sm:$0xff] %vm322_vm4, %v4155_v40  ;;  %v4145_v41 = vpop.f32.mrb[6].mxu1 }
 0x2e8   : > { %v4156_v42 = vadd.f32 %v4145_v41, %v4019_v36  ;;  %v3375_v43 = vpop.f32.mrb[7].mxu1 }
 0x2e9   : > { %v4157_v44 = vadd.f32 %v3375_v43, %v2075_v37 }
 0x2ea   : > { %3415 = vst.msk [vmem:[%s278_s12 + $0x18] sm:$0xff] %vm322_vm4, %v4156_v42 }
 0x2eb   : > { %3414 = vst.msk [vmem:[%s278_s12 + $0x10] sm:$0xff] %vm322_vm4, %v4157_v44  ;;  %v4148_v45 = vpop.f32.mrb[0].mxu1 }
 0x2ec   : > { %3417 = vst.msk [vmem:[%s278_s12 + $0x28] sm:$0xff] %vm322_vm4, %v4148_v45  ;;  %v3385_v46 = vpop.f32.mrb[1].mxu1 }
 0x2ed   : > { %3416 = vst.msk [vmem:[%s278_s12 + $0x20] sm:$0xff] %vm322_vm4, %v3385_v46 }
 0x2ef   : > { %v4151_v47 = vpop.f32.mrb[2].mxu1 }
 0x2f0   : > { %3419 = vst.msk [vmem:[%s278_s12 + $0x38] sm:$0xff] %vm322_vm4, %v4151_v47  ;;  %v3395_v48 = vpop.f32.mrb[3].mxu1 }
 0x2f1   : > { %3418 = vst.msk [vmem:[%s278_s12 + $0x30] sm:$0xff] %vm322_vm4, %v3395_v48 }
 0x2f2 PF: > { %s17_s24 = sadd.s32 1, %s4305_s24  }
 0x2f3   : > { %p14_p4 = scmp.ge.s32.totalorder %s17_s24, 4  }
 0x2f5   :  { %16 = sbr.rel (!%p14_p4) target bundleno = 1 (0x1), region = 169 }

</bundles_post_ra>
